<compile_context>
chip_gen: v6e
topology: v6e:2x2x1
jax: 0.10.0
libtpu: 0.0.40
codegen_flags: <defaults>
</compile_context>

<pallas_src>
import jax
import jax.numpy as jnp
from jax.experimental import pallas as pl
from jax.experimental.pallas import tpu as pltpu


def _round_up(x, m):
    return (x + m - 1) // m * m


def _gru_chunk_kernel(tok_ref,   # (Tp,)      int32 scalar-prefetch (SMEM)
                      emb_ref,   # (V, 1, Hp) embedding table (VMEM resident)
                      h0_ref,    # (1, Hp)    initial hidden (lane-padded)
                      wih_ref,   # (Hp, 3*Hp) W_ih^T, gate blocks 128-lane aligned
                      whh_ref,   # (Hp, 3*Hp) W_hh^T, gate blocks 128-lane aligned
                      b_ref,     # (2, 3*Hp)  row0 = b_ih, row1 = b_hh (aligned)
                      out_ref,   # (C, Hp)    GRU outputs for this chunk
                      x_ref,     # (C, Hp)    scratch: gathered embeddings
                      h_ref):    # (8, Hp)    scratch: row0 = carried hidden
    C, Hp = x_ref.shape
    t = pl.program_id(0)

    @pl.when(t == 0)
    def _init():
        h_ref[...] = jnp.zeros_like(h_ref)
        h_ref[0:1, :] = h0_ref[...]

    # ---- Gather the C embedding rows of this chunk from the resident table.
    base = t * C
    for c in range(C):
        tok = tok_ref[base + c]
        x_ref[c:c + 1, :] = emb_ref[tok]                      # (1, Hp)

    # ---- Input-side gates for the whole chunk: ONE MXU pass (hoisted W_ih).
    gi = jnp.dot(x_ref[...], wih_ref[...],
                 preferred_element_type=jnp.float32) + b_ref[0:1, :]   # (C, 3*Hp)
    b_hh = b_ref[1:2, :]                                               # (1, 3*Hp)

    # ---- Sequential recurrence over the C timesteps (statically unrolled).
    for c in range(C):
        gh = jnp.dot(h_ref[...], whh_ref[...],
                     preferred_element_type=jnp.float32)[0:1, :] + b_hh  # (1, 3*Hp)
        gi_c = gi[c:c + 1, :]
        r = jax.nn.sigmoid(gi_c[:, 0:Hp] + gh[:, 0:Hp])
        z = jax.nn.sigmoid(gi_c[:, Hp:2 * Hp] + gh[:, Hp:2 * Hp])
        n = jnp.tanh(gi_c[:, 2 * Hp:3 * Hp] + r * gh[:, 2 * Hp:3 * Hp])
        h_new = (1.0 - z) * n + z * h_ref[0:1, :]
        out_ref[c:c + 1, :] = h_new.astype(out_ref.dtype)
        h_ref[0:1, :] = h_new          # carry to the next step / chunk


def pack_encoder_params(params):
    """Pad/repack PyTorch-layout EncoderRNN params into TPU-friendly tiles.

    Call ONCE at load time. Each gate gets its own 128-lane-aligned column
    block (zero-padded), so all in-kernel gate slices are lane-aligned views.
    The padded lanes provably stay exactly zero through the GRU update.
    """
    emb = jnp.asarray(params["embedding"], jnp.float32)
    V, H = emb.shape
    Hp = max(128, _round_up(H, 128))

    emb_p = jnp.zeros((V, 1, Hp), jnp.float32).at[:, 0, :H].set(emb)

    def pad_w(w):                       # (3H, H) -> (Hp, 3*Hp), transposed, gate-aligned
        w = jnp.asarray(w, jnp.float32)
        out = jnp.zeros((Hp, 3 * Hp), jnp.float32)
        for g in range(3):
            out = out.at[:H, g * Hp:g * Hp + H].set(w[g * H:(g + 1) * H, :].T)
        return out

    def pad_b(bvec):                    # (3H,) -> (3*Hp,), gate-aligned
        bvec = jnp.asarray(bvec, jnp.float32)
        out = jnp.zeros((3 * Hp,), jnp.float32)
        for g in range(3):
            out = out.at[g * Hp:g * Hp + H].set(bvec[g * H:(g + 1) * H])
        return out

    b_p = jnp.stack([pad_b(params["b_ih"]), pad_b(params["b_hh"])], axis=0)   # (2, 3*Hp)
    return {"emb": emb_p, "w_ih": pad_w(params["w_ih"]), "w_hh": pad_w(params["w_hh"]),
            "b": b_p, "H": H, "Hp": Hp, "V": V}


def encoder_rnn_sequence(tokens, hidden, packed, *, chunk=8):
    """Run the EncoderRNN over a whole token sequence in ONE pallas_call.

    tokens : (T,) int32 token ids
    hidden : (1, 1, H) float32 initial hidden
    packed : output of pack_encoder_params
    Returns (outputs (T, 1, H), final_hidden (1, 1, H)) — identical to looping
    the PyTorch module's forward over the sequence.
    """
    H, Hp, V = packed["H"], packed["Hp"], packed["V"]
    T = int(tokens.shape[0])
    C = max(8, _round_up(chunk, 8))            # timesteps per grid step (sublane aligned)
    n_chunks = (T + C - 1) // C
    Tp = n_chunks * C

    # Pad the token sequence with id 0; padded steps are computed but their
    # outputs are sliced off and they never feed back into returned state.
    tok = jnp.zeros((Tp,), jnp.int32).at[:T].set(jnp.asarray(tokens, jnp.int32).reshape(T))
    h0 = jnp.zeros((1, Hp), jnp.float32).at[:, :H].set(
        jnp.asarray(hidden, jnp.float32).reshape(1, H))

    grid_spec = pltpu.PrefetchScalarGridSpec(
        num_scalar_prefetch=1,
        grid=(n_chunks,),
        in_specs=[
            # Grid-invariant blocks: fetched once, resident in VMEM all sequence.
            pl.BlockSpec((V, 1, Hp), lambda t, tok_ref: (0, 0, 0)),    # emb table
            pl.BlockSpec((1, Hp), lambda t, tok_ref: (0, 0)),          # h0
            pl.BlockSpec((Hp, 3 * Hp), lambda t, tok_ref: (0, 0)),     # W_ih^T
            pl.BlockSpec((Hp, 3 * Hp), lambda t, tok_ref: (0, 0)),     # W_hh^T
            pl.BlockSpec((2, 3 * Hp), lambda t, tok_ref: (0, 0)),      # biases
        ],
        out_specs=pl.BlockSpec((C, Hp), lambda t, tok_ref: (t, 0)),
        scratch_shapes=[pltpu.VMEM((C, Hp), jnp.float32),   # gathered x chunk
                        pltpu.VMEM((8, Hp), jnp.float32)],  # carried hidden tile
    )

    out = pl.pallas_call(
        _gru_chunk_kernel,
        out_shape=jax.ShapeDtypeStruct((Tp, Hp), jnp.float32),
        grid_spec=grid_spec,
        compiler_params=pltpu.CompilerParams(
            # Hidden state is carried across grid steps -> sequential grid.
            dimension_semantics=("arbitrary",),
            vmem_limit_bytes=32 * 1024 * 1024,
        ),
    )(tok, packed["emb"], h0, packed["w_ih"], packed["w_hh"], packed["b"])

    # TODO(synk): downstream consumers could read the padded (Tp, Hp) layout
    # directly and skip this slice/copy when H << Hp.
    outputs = out[:T, :H].reshape(T, 1, H)
    final_hidden = out[T - 1, :H].reshape(1, 1, H)
    return outputs, final_hidden


def encoder_rnn_forward(token, hidden, packed):
    """Exact semantics of EncoderRNN.forward(input, hidden): one token step."""
    tokens = jnp.asarray(token, jnp.int32).reshape(1)
    outputs, h_new = encoder_rnn_sequence(tokens, hidden, packed)
    return outputs.reshape(1, 1, -1), h_new


def _reference_sequence(tokens, hidden, params):
    """Pure-JAX reference matching torch.nn.GRU semantics (gate order r,z,n)."""
    H = params["embedding"].shape[1]

    def step(h, tok):
        x = params["embedding"][tok]
        gi = params["w_ih"] @ x + params["b_ih"]
        gh = params["w_hh"] @ h + params["b_hh"]
        i_r, i_z, i_n = gi[:H], gi[H:2 * H], gi[2 * H:]
        h_r, h_z, h_n = gh[:H], gh[H:2 * H], gh[2 * H:]
        r = jax.nn.sigmoid(i_r + h_r)
        z = jax.nn.sigmoid(i_z + h_z)
        n = jnp.tanh(i_n + r * h_n)
        new_h = (1.0 - z) * n + z * h
        return new_h, new_h

    h_final, outs = jax.lax.scan(step, hidden.reshape(H), tokens)
    return outs.reshape(-1, 1, H), h_final.reshape(1, 1, H)


if __name__ == "__main__":
    INPUT_SIZE = 16   # vocab size
    HIDDEN = 32
    SEQ_LEN = 8

    key = jax.random.PRNGKey(0)
    k_emb, k_wih, k_whh, k_bih, k_bhh, k_tok = jax.random.split(key, 6)
    scale = 1.0 / jnp.sqrt(HIDDEN)
    params = {
        "embedding": jax.random.normal(k_emb, (INPUT_SIZE, HIDDEN), jnp.float32),
        "w_ih": jax.random.uniform(k_wih, (3 * HIDDEN, HIDDEN), jnp.float32, -scale, scale),
        "w_hh": jax.random.uniform(k_whh, (3 * HIDDEN, HIDDEN), jnp.float32, -scale, scale),
        "b_ih": jax.random.uniform(k_bih, (3 * HIDDEN,), jnp.float32, -scale, scale),
        "b_hh": jax.random.uniform(k_bhh, (3 * HIDDEN,), jnp.float32, -scale, scale),
    }

    tokens = jax.random.randint(k_tok, (SEQ_LEN,), 0, INPUT_SIZE, jnp.int32)
    hidden0 = jnp.zeros((1, 1, HIDDEN), jnp.float32)   # init_hidden()

    packed = pack_encoder_params(params)               # pack ONCE

    # Fused path: the whole sequence in one pallas_call.
    outs, h_final = encoder_rnn_sequence(tokens, hidden0, packed)
    outs = jax.block_until_ready(outs)
    h_final = jax.block_until_ready(h_final)

    ref_outs, ref_h = _reference_sequence(tokens, hidden0, params)
    assert outs.shape == (SEQ_LEN, 1, HIDDEN) and h_final.shape == (1, 1, HIDDEN)
    assert jnp.allclose(outs, ref_outs, atol=3e-5), "sequence outputs mismatch vs reference"
    assert jnp.allclose(h_final, ref_h, atol=3e-5), "final hidden mismatch vs reference"

    # Single-step forward (module.forward semantics).
    out1, h1 = encoder_rnn_forward(tokens[0], hidden0, packed)
    out1 = jax.block_until_ready(out1)
    h1 = jax.block_until_ready(h1)
    ref_out1, ref_h1 = _reference_sequence(tokens[:1], hidden0, params)
    assert jnp.allclose(out1, ref_out1, atol=3e-5), "single-step output mismatch vs reference"
    assert jnp.allclose(h1, ref_h1, atol=3e-5), "single-step hidden mismatch vs reference"

    print("KERNEL_OK")
</pallas_src>

<mosaic_0001>
module attributes {stable_mosaic.version = 11 : i64} {
  func.func @_gru_chunk_kernel(%arg0: i32, %arg1: memref<8xi32, #tpu.memory_space<smem>>, %arg2: memref<16x1x128xf32, #tpu.memory_space<vmem>>, %arg3: memref<1x128xf32, #tpu.memory_space<vmem>>, %arg4: memref<128x384xf32, #tpu.memory_space<vmem>>, %arg5: memref<128x384xf32, #tpu.memory_space<vmem>>, %arg6: memref<2x384xf32, #tpu.memory_space<vmem>>, %arg7: memref<8x128xf32, #tpu.memory_space<vmem>>, %arg8: memref<8x128xf32, #tpu.memory_space<vmem>>, %arg9: memref<8x128xf32, #tpu.memory_space<vmem>>) attributes {dimension_semantics = [#tpu.dimension_semantics<arbitrary>], iteration_bounds = array<i64: 1>, scalar_prefetch = 1 : i64, scratch_operands = 2 : i64, tpu.core_type = #tpu.core_type<tc>, window_params = [{pipeline_mode = #tpu.pipeline_mode<synchronous>, transform_indices = @transform_0, window_bounds = array<i64: 16, 1, 128>}, {pipeline_mode = #tpu.pipeline_mode<synchronous>, transform_indices = @transform_1, window_bounds = array<i64: 1, 128>}, {pipeline_mode = #tpu.pipeline_mode<synchronous>, transform_indices = @transform_2, window_bounds = array<i64: 128, 384>}, {pipeline_mode = #tpu.pipeline_mode<synchronous>, transform_indices = @transform_3, window_bounds = array<i64: 128, 384>}, {pipeline_mode = #tpu.pipeline_mode<synchronous>, transform_indices = @transform_4, window_bounds = array<i64: 2, 384>}, {transform_indices = @transform_5, window_bounds = array<i64: 8, 128>}]} {
    %c0_i32 = arith.constant 0 : i32
    %0 = arith.cmpi eq, %arg0, %c0_i32 : i32
    %1 = arith.extui %0 : i1 to i32
    %c0_i32_0 = arith.constant 0 : i32
    %2 = arith.cmpi ne, %1, %c0_i32_0 : i32
    scf.if %2 {
      %cst_146 = arith.constant 0.000000e+00 : f32
      %347 = vector.broadcast %cst_146 : f32 to vector<8x128xf32>
      %c0_147 = arith.constant 0 : index
      %c0_148 = arith.constant 0 : index
      %348 = vector.load %arg9[%c0_147, %c0_148] : memref<8x128xf32, #tpu.memory_space<vmem>>, vector<8x128xf32>
      tpu.vector_store %arg9[%c0_147, %c0_148], %347 {strides = array<i32>} : memref<8x128xf32, #tpu.memory_space<vmem>>, vector<8x128xf32>,
      %c0_149 = arith.constant 0 : index
      %c0_150 = arith.constant 0 : index
      %349 = vector.load %arg3[%c0_149, %c0_150] : memref<1x128xf32, #tpu.memory_space<vmem>>, vector<1x128xf32>
      %c0_151 = arith.constant 0 : index
      %c0_152 = arith.constant 0 : index
      %350 = vector.load %arg9[%c0_151, %c0_152] : memref<8x128xf32, #tpu.memory_space<vmem>>, vector<1x128xf32>
      tpu.vector_store %arg9[%c0_151, %c0_152], %349 {strides = array<i32>} : memref<8x128xf32, #tpu.memory_space<vmem>>, vector<1x128xf32>,
    } else {
    }
    %c8_i32 = arith.constant 8 : i32
    %3 = arith.muli %arg0, %c8_i32 : i32
    %c0_i32_1 = arith.constant 0 : i32
    %4 = arith.addi %3, %c0_i32_1 : i32
    %5 = arith.index_cast %4 : i32 to index
    %6 = memref.load %arg1[%5] : memref<8xi32, #tpu.memory_space<smem>>
    %7 = arith.index_cast %6 : i32 to index
    %c0 = arith.constant 0 : index
    %c0_2 = arith.constant 0 : index
    %8 = vector.load %arg2[%7, %c0, %c0_2] : memref<16x1x128xf32, #tpu.memory_space<vmem>>, vector<1x1x128xf32>
    %9 = vector.shape_cast %8 : vector<1x1x128xf32> to vector<1x128xf32>
    %c0_3 = arith.constant 0 : index
    %c0_4 = arith.constant 0 : index
    %10 = vector.load %arg8[%c0_3, %c0_4] : memref<8x128xf32, #tpu.memory_space<vmem>>, vector<1x128xf32>
    tpu.vector_store %arg8[%c0_3, %c0_4], %9 {strides = array<i32>} : memref<8x128xf32, #tpu.memory_space<vmem>>, vector<1x128xf32>,
    %c1_i32 = arith.constant 1 : i32
    %11 = arith.addi %3, %c1_i32 : i32
    %12 = arith.index_cast %11 : i32 to index
    %13 = memref.load %arg1[%12] : memref<8xi32, #tpu.memory_space<smem>>
    %14 = arith.index_cast %13 : i32 to index
    %c0_5 = arith.constant 0 : index
    %c0_6 = arith.constant 0 : index
    %15 = vector.load %arg2[%14, %c0_5, %c0_6] : memref<16x1x128xf32, #tpu.memory_space<vmem>>, vector<1x1x128xf32>
    %16 = vector.shape_cast %15 : vector<1x1x128xf32> to vector<1x128xf32>
    %c1 = arith.constant 1 : index
    %c0_7 = arith.constant 0 : index
    %17 = vector.load %arg8[%c1, %c0_7] : memref<8x128xf32, #tpu.memory_space<vmem>>, vector<1x128xf32>
    tpu.vector_store %arg8[%c1, %c0_7], %16 {strides = array<i32>} : memref<8x128xf32, #tpu.memory_space<vmem>>, vector<1x128xf32>,
    %c2_i32 = arith.constant 2 : i32
    %18 = arith.addi %3, %c2_i32 : i32
    %19 = arith.index_cast %18 : i32 to index
    %20 = memref.load %arg1[%19] : memref<8xi32, #tpu.memory_space<smem>>
    %21 = arith.index_cast %20 : i32 to index
    %c0_8 = arith.constant 0 : index
    %c0_9 = arith.constant 0 : index
    %22 = vector.load %arg2[%21, %c0_8, %c0_9] : memref<16x1x128xf32, #tpu.memory_space<vmem>>, vector<1x1x128xf32>
    %23 = vector.shape_cast %22 : vector<1x1x128xf32> to vector<1x128xf32>
    %c2 = arith.constant 2 : index
    %c0_10 = arith.constant 0 : index
    %24 = vector.load %arg8[%c2, %c0_10] : memref<8x128xf32, #tpu.memory_space<vmem>>, vector<1x128xf32>
    tpu.vector_store %arg8[%c2, %c0_10], %23 {strides = array<i32>} : memref<8x128xf32, #tpu.memory_space<vmem>>, vector<1x128xf32>,
    %c3_i32 = arith.constant 3 : i32
    %25 = arith.addi %3, %c3_i32 : i32
    %26 = arith.index_cast %25 : i32 to index
    %27 = memref.load %arg1[%26] : memref<8xi32, #tpu.memory_space<smem>>
    %28 = arith.index_cast %27 : i32 to index
    %c0_11 = arith.constant 0 : index
    %c0_12 = arith.constant 0 : index
    %29 = vector.load %arg2[%28, %c0_11, %c0_12] : memref<16x1x128xf32, #tpu.memory_space<vmem>>, vector<1x1x128xf32>
    %30 = vector.shape_cast %29 : vector<1x1x128xf32> to vector<1x128xf32>
    %c3 = arith.constant 3 : index
    %c0_13 = arith.constant 0 : index
    %31 = vector.load %arg8[%c3, %c0_13] : memref<8x128xf32, #tpu.memory_space<vmem>>, vector<1x128xf32>
    tpu.vector_store %arg8[%c3, %c0_13], %30 {strides = array<i32>} : memref<8x128xf32, #tpu.memory_space<vmem>>, vector<1x128xf32>,
    %c4_i32 = arith.constant 4 : i32
    %32 = arith.addi %3, %c4_i32 : i32
    %33 = arith.index_cast %32 : i32 to index
    %34 = memref.load %arg1[%33] : memref<8xi32, #tpu.memory_space<smem>>
    %35 = arith.index_cast %34 : i32 to index
    %c0_14 = arith.constant 0 : index
    %c0_15 = arith.constant 0 : index
    %36 = vector.load %arg2[%35, %c0_14, %c0_15] : memref<16x1x128xf32, #tpu.memory_space<vmem>>, vector<1x1x128xf32>
    %37 = vector.shape_cast %36 : vector<1x1x128xf32> to vector<1x128xf32>
    %c4 = arith.constant 4 : index
    %c0_16 = arith.constant 0 : index
    %38 = vector.load %arg8[%c4, %c0_16] : memref<8x128xf32, #tpu.memory_space<vmem>>, vector<1x128xf32>
    tpu.vector_store %arg8[%c4, %c0_16], %37 {strides = array<i32>} : memref<8x128xf32, #tpu.memory_space<vmem>>, vector<1x128xf32>,
    %c5_i32 = arith.constant 5 : i32
    %39 = arith.addi %3, %c5_i32 : i32
    %40 = arith.index_cast %39 : i32 to index
    %41 = memref.load %arg1[%40] : memref<8xi32, #tpu.memory_space<smem>>
    %42 = arith.index_cast %41 : i32 to index
    %c0_17 = arith.constant 0 : index
    %c0_18 = arith.constant 0 : index
    %43 = vector.load %arg2[%42, %c0_17, %c0_18] : memref<16x1x128xf32, #tpu.memory_space<vmem>>, vector<1x1x128xf32>
    %44 = vector.shape_cast %43 : vector<1x1x128xf32> to vector<1x128xf32>
    %c5 = arith.constant 5 : index
    %c0_19 = arith.constant 0 : index
    %45 = vector.load %arg8[%c5, %c0_19] : memref<8x128xf32, #tpu.memory_space<vmem>>, vector<1x128xf32>
    tpu.vector_store %arg8[%c5, %c0_19], %44 {strides = array<i32>} : memref<8x128xf32, #tpu.memory_space<vmem>>, vector<1x128xf32>,
    %c6_i32 = arith.constant 6 : i32
    %46 = arith.addi %3, %c6_i32 : i32
    %47 = arith.index_cast %46 : i32 to index
    %48 = memref.load %arg1[%47] : memref<8xi32, #tpu.memory_space<smem>>
    %49 = arith.index_cast %48 : i32 to index
    %c0_20 = arith.constant 0 : index
    %c0_21 = arith.constant 0 : index
    %50 = vector.load %arg2[%49, %c0_20, %c0_21] : memref<16x1x128xf32, #tpu.memory_space<vmem>>, vector<1x1x128xf32>
    %51 = vector.shape_cast %50 : vector<1x1x128xf32> to vector<1x128xf32>
    %c6 = arith.constant 6 : index
    %c0_22 = arith.constant 0 : index
    %52 = vector.load %arg8[%c6, %c0_22] : memref<8x128xf32, #tpu.memory_space<vmem>>, vector<1x128xf32>
    tpu.vector_store %arg8[%c6, %c0_22], %51 {strides = array<i32>} : memref<8x128xf32, #tpu.memory_space<vmem>>, vector<1x128xf32>,
    %c7_i32 = arith.constant 7 : i32
    %53 = arith.addi %3, %c7_i32 : i32
    %54 = arith.index_cast %53 : i32 to index
    %55 = memref.load %arg1[%54] : memref<8xi32, #tpu.memory_space<smem>>
    %56 = arith.index_cast %55 : i32 to index
    %c0_23 = arith.constant 0 : index
    %c0_24 = arith.constant 0 : index
    %57 = vector.load %arg2[%56, %c0_23, %c0_24] : memref<16x1x128xf32, #tpu.memory_space<vmem>>, vector<1x1x128xf32>
    %58 = vector.shape_cast %57 : vector<1x1x128xf32> to vector<1x128xf32>
    %c7 = arith.constant 7 : index
    %c0_25 = arith.constant 0 : index
    %59 = vector.load %arg8[%c7, %c0_25] : memref<8x128xf32, #tpu.memory_space<vmem>>, vector<1x128xf32>
    tpu.vector_store %arg8[%c7, %c0_25], %58 {strides = array<i32>} : memref<8x128xf32, #tpu.memory_space<vmem>>, vector<1x128xf32>,
    %c0_26 = arith.constant 0 : index
    %c0_27 = arith.constant 0 : index
    %60 = vector.load %arg8[%c0_26, %c0_27] : memref<8x128xf32, #tpu.memory_space<vmem>>, vector<8x128xf32>
    %c0_28 = arith.constant 0 : index
    %c0_29 = arith.constant 0 : index
    %61 = vector.load %arg4[%c0_28, %c0_29] : memref<128x384xf32, #tpu.memory_space<vmem>>, vector<128x384xf32>
    %cst = arith.constant dense<0.000000e+00> : vector<8x384xf32>
    %62 = tpu.matmul %60, %61, %cst {dimension_numbers = #tpu.dot_dimension_numbers<[1], [0], [0], [1], [0, 0, 1, 1], [], []>} : vector<8x128xf32>, vector<128x384xf32>, vector<8x384xf32> -> vector<8x384xf32>
    %c0_30 = arith.constant 0 : index
    %c0_31 = arith.constant 0 : index
    %63 = vector.load %arg6[%c0_30, %c0_31] : memref<2x384xf32, #tpu.memory_space<vmem>>, vector<1x384xf32>
    %64 = vector.broadcast %63 : vector<1x384xf32> to vector<8x384xf32>
    %65 = arith.addf %62, %64 : vector<8x384xf32>
    %c1_32 = arith.constant 1 : index
    %c0_33 = arith.constant 0 : index
    %66 = vector.load %arg6[%c1_32, %c0_33] : memref<2x384xf32, #tpu.memory_space<vmem>>, vector<1x384xf32>
    %c0_34 = arith.constant 0 : index
    %c0_35 = arith.constant 0 : index
    %67 = vector.load %arg9[%c0_34, %c0_35] : memref<8x128xf32, #tpu.memory_space<vmem>>, vector<8x128xf32>
    %c0_36 = arith.constant 0 : index
    %c0_37 = arith.constant 0 : index
    %68 = vector.load %arg5[%c0_36, %c0_37] : memref<128x384xf32, #tpu.memory_space<vmem>>, vector<128x384xf32>
    %cst_38 = arith.constant dense<0.000000e+00> : vector<8x384xf32>
    %69 = tpu.matmul %67, %68, %cst_38 {dimension_numbers = #tpu.dot_dimension_numbers<[1], [0], [0], [1], [0, 0, 1, 1], [], []>} : vector<8x128xf32>, vector<128x384xf32>, vector<8x384xf32> -> vector<8x384xf32>
    %70 = vector.extract_strided_slice %69 {offsets = [0, 0], sizes = [1, 384], strides = [1, 1]} : vector<8x384xf32> to vector<1x384xf32>
    %71 = arith.addf %70, %66 : vector<1x384xf32>
    %72 = vector.extract_strided_slice %65 {offsets = [0, 0], sizes = [1, 384], strides = [1, 1]} : vector<8x384xf32> to vector<1x384xf32>
    %73 = vector.extract_strided_slice %72 {offsets = [0, 0], sizes = [1, 128], strides = [1, 1]} : vector<1x384xf32> to vector<1x128xf32>
    %74 = vector.extract_strided_slice %71 {offsets = [0, 0], sizes = [1, 128], strides = [1, 1]} : vector<1x384xf32> to vector<1x128xf32>
    %75 = arith.addf %73, %74 : vector<1x128xf32>
    %76 = arith.negf %75 : vector<1x128xf32>
    %77 = math.exp %76 : vector<1x128xf32>
    %cst_39 = arith.constant 1.000000e+00 : f32
    %78 = vector.broadcast %cst_39 : f32 to vector<1x128xf32>
    %79 = arith.addf %78, %77 : vector<1x128xf32>
    %80 = arith.divf %78, %79 : vector<1x128xf32>
    %81 = vector.extract_strided_slice %72 {offsets = [0, 128], sizes = [1, 128], strides = [1, 1]} : vector<1x384xf32> to vector<1x128xf32>
    %82 = vector.extract_strided_slice %71 {offsets = [0, 128], sizes = [1, 128], strides = [1, 1]} : vector<1x384xf32> to vector<1x128xf32>
    %83 = arith.addf %81, %82 : vector<1x128xf32>
    %84 = arith.negf %83 : vector<1x128xf32>
    %85 = math.exp %84 : vector<1x128xf32>
    %cst_40 = arith.constant 1.000000e+00 : f32
    %86 = vector.broadcast %cst_40 : f32 to vector<1x128xf32>
    %87 = arith.addf %86, %85 : vector<1x128xf32>
    %88 = arith.divf %86, %87 : vector<1x128xf32>
    %89 = vector.extract_strided_slice %72 {offsets = [0, 256], sizes = [1, 128], strides = [1, 1]} : vector<1x384xf32> to vector<1x128xf32>
    %90 = vector.extract_strided_slice %71 {offsets = [0, 256], sizes = [1, 128], strides = [1, 1]} : vector<1x384xf32> to vector<1x128xf32>
    %91 = arith.mulf %80, %90 : vector<1x128xf32>
    %92 = arith.addf %89, %91 : vector<1x128xf32>
    %93 = math.tanh %92 : vector<1x128xf32>
    %cst_41 = arith.constant 1.000000e+00 : f32
    %94 = vector.broadcast %cst_41 : f32 to vector<1x128xf32>
    %95 = arith.subf %94, %88 : vector<1x128xf32>
    %96 = arith.mulf %95, %93 : vector<1x128xf32>
    %c0_42 = arith.constant 0 : index
    %c0_43 = arith.constant 0 : index
    %97 = vector.load %arg9[%c0_42, %c0_43] : memref<8x128xf32, #tpu.memory_space<vmem>>, vector<1x128xf32>
    %98 = arith.mulf %88, %97 : vector<1x128xf32>
    %99 = arith.addf %96, %98 : vector<1x128xf32>
    %c0_44 = arith.constant 0 : index
    %c0_45 = arith.constant 0 : index
    %100 = vector.load %arg7[%c0_44, %c0_45] : memref<8x128xf32, #tpu.memory_space<vmem>>, vector<1x128xf32>
    tpu.vector_store %arg7[%c0_44, %c0_45], %99 {strides = array<i32>} : memref<8x128xf32, #tpu.memory_space<vmem>>, vector<1x128xf32>,
    %c0_46 = arith.constant 0 : index
    %c0_47 = arith.constant 0 : index
    %101 = vector.load %arg9[%c0_46, %c0_47] : memref<8x128xf32, #tpu.memory_space<vmem>>, vector<1x128xf32>
    tpu.vector_store %arg9[%c0_46, %c0_47], %99 {strides = array<i32>} : memref<8x128xf32, #tpu.memory_space<vmem>>, vector<1x128xf32>,
    %c0_48 = arith.constant 0 : index
    %c0_49 = arith.constant 0 : index
    %102 = vector.load %arg9[%c0_48, %c0_49] : memref<8x128xf32, #tpu.memory_space<vmem>>, vector<8x128xf32>
    %c0_50 = arith.constant 0 : index
    %c0_51 = arith.constant 0 : index
    %103 = vector.load %arg5[%c0_50, %c0_51] : memref<128x384xf32, #tpu.memory_space<vmem>>, vector<128x384xf32>
    %cst_52 = arith.constant dense<0.000000e+00> : vector<8x384xf32>
    %104 = tpu.matmul %102, %103, %cst_52 {dimension_numbers = #tpu.dot_dimension_numbers<[1], [0], [0], [1], [0, 0, 1, 1], [], []>} : vector<8x128xf32>, vector<128x384xf32>, vector<8x384xf32> -> vector<8x384xf32>
    %105 = vector.extract_strided_slice %104 {offsets = [0, 0], sizes = [1, 384], strides = [1, 1]} : vector<8x384xf32> to vector<1x384xf32>
    %106 = arith.addf %105, %66 : vector<1x384xf32>
    %107 = vector.extract_strided_slice %65 {offsets = [1, 0], sizes = [1, 384], strides = [1, 1]} : vector<8x384xf32> to vector<1x384xf32>
    %108 = vector.extract_strided_slice %107 {offsets = [0, 0], sizes = [1, 128], strides = [1, 1]} : vector<1x384xf32> to vector<1x128xf32>
    %109 = vector.extract_strided_slice %106 {offsets = [0, 0], sizes = [1, 128], strides = [1, 1]} : vector<1x384xf32> to vector<1x128xf32>
    %110 = arith.addf %108, %109 : vector<1x128xf32>
    %111 = arith.negf %110 : vector<1x128xf32>
    %112 = math.exp %111 : vector<1x128xf32>
    %cst_53 = arith.constant 1.000000e+00 : f32
    %113 = vector.broadcast %cst_53 : f32 to vector<1x128xf32>
    %114 = arith.addf %113, %112 : vector<1x128xf32>
    %115 = arith.divf %113, %114 : vector<1x128xf32>
    %116 = vector.extract_strided_slice %107 {offsets = [0, 128], sizes = [1, 128], strides = [1, 1]} : vector<1x384xf32> to vector<1x128xf32>
    %117 = vector.extract_strided_slice %106 {offsets = [0, 128], sizes = [1, 128], strides = [1, 1]} : vector<1x384xf32> to vector<1x128xf32>
    %118 = arith.addf %116, %117 : vector<1x128xf32>
    %119 = arith.negf %118 : vector<1x128xf32>
    %120 = math.exp %119 : vector<1x128xf32>
    %cst_54 = arith.constant 1.000000e+00 : f32
    %121 = vector.broadcast %cst_54 : f32 to vector<1x128xf32>
    %122 = arith.addf %121, %120 : vector<1x128xf32>
    %123 = arith.divf %121, %122 : vector<1x128xf32>
    %124 = vector.extract_strided_slice %107 {offsets = [0, 256], sizes = [1, 128], strides = [1, 1]} : vector<1x384xf32> to vector<1x128xf32>
    %125 = vector.extract_strided_slice %106 {offsets = [0, 256], sizes = [1, 128], strides = [1, 1]} : vector<1x384xf32> to vector<1x128xf32>
    %126 = arith.mulf %115, %125 : vector<1x128xf32>
    %127 = arith.addf %124, %126 : vector<1x128xf32>
    %128 = math.tanh %127 : vector<1x128xf32>
    %cst_55 = arith.constant 1.000000e+00 : f32
    %129 = vector.broadcast %cst_55 : f32 to vector<1x128xf32>
    %130 = arith.subf %129, %123 : vector<1x128xf32>
    %131 = arith.mulf %130, %128 : vector<1x128xf32>
    %c0_56 = arith.constant 0 : index
    %c0_57 = arith.constant 0 : index
    %132 = vector.load %arg9[%c0_56, %c0_57] : memref<8x128xf32, #tpu.memory_space<vmem>>, vector<1x128xf32>
    %133 = arith.mulf %123, %132 : vector<1x128xf32>
    %134 = arith.addf %131, %133 : vector<1x128xf32>
    %c1_58 = arith.constant 1 : index
    %c0_59 = arith.constant 0 : index
    %135 = vector.load %arg7[%c1_58, %c0_59] : memref<8x128xf32, #tpu.memory_space<vmem>>, vector<1x128xf32>
    tpu.vector_store %arg7[%c1_58, %c0_59], %134 {strides = array<i32>} : memref<8x128xf32, #tpu.memory_space<vmem>>, vector<1x128xf32>,
    %c0_60 = arith.constant 0 : index
    %c0_61 = arith.constant 0 : index
    %136 = vector.load %arg9[%c0_60, %c0_61] : memref<8x128xf32, #tpu.memory_space<vmem>>, vector<1x128xf32>
    tpu.vector_store %arg9[%c0_60, %c0_61], %134 {strides = array<i32>} : memref<8x128xf32, #tpu.memory_space<vmem>>, vector<1x128xf32>,
    %c0_62 = arith.constant 0 : index
    %c0_63 = arith.constant 0 : index
    %137 = vector.load %arg9[%c0_62, %c0_63] : memref<8x128xf32, #tpu.memory_space<vmem>>, vector<8x128xf32>
    %c0_64 = arith.constant 0 : index
    %c0_65 = arith.constant 0 : index
    %138 = vector.load %arg5[%c0_64, %c0_65] : memref<128x384xf32, #tpu.memory_space<vmem>>, vector<128x384xf32>
    %cst_66 = arith.constant dense<0.000000e+00> : vector<8x384xf32>
    %139 = tpu.matmul %137, %138, %cst_66 {dimension_numbers = #tpu.dot_dimension_numbers<[1], [0], [0], [1], [0, 0, 1, 1], [], []>} : vector<8x128xf32>, vector<128x384xf32>, vector<8x384xf32> -> vector<8x384xf32>
    %140 = vector.extract_strided_slice %139 {offsets = [0, 0], sizes = [1, 384], strides = [1, 1]} : vector<8x384xf32> to vector<1x384xf32>
    %141 = arith.addf %140, %66 : vector<1x384xf32>
    %142 = vector.extract_strided_slice %65 {offsets = [2, 0], sizes = [1, 384], strides = [1, 1]} : vector<8x384xf32> to vector<1x384xf32>
    %143 = vector.extract_strided_slice %142 {offsets = [0, 0], sizes = [1, 128], strides = [1, 1]} : vector<1x384xf32> to vector<1x128xf32>
    %144 = vector.extract_strided_slice %141 {offsets = [0, 0], sizes = [1, 128], strides = [1, 1]} : vector<1x384xf32> to vector<1x128xf32>
    %145 = arith.addf %143, %144 : vector<1x128xf32>
    %146 = arith.negf %145 : vector<1x128xf32>
    %147 = math.exp %146 : vector<1x128xf32>
    %cst_67 = arith.constant 1.000000e+00 : f32
    %148 = vector.broadcast %cst_67 : f32 to vector<1x128xf32>
    %149 = arith.addf %148, %147 : vector<1x128xf32>
    %150 = arith.divf %148, %149 : vector<1x128xf32>
    %151 = vector.extract_strided_slice %142 {offsets = [0, 128], sizes = [1, 128], strides = [1, 1]} : vector<1x384xf32> to vector<1x128xf32>
    %152 = vector.extract_strided_slice %141 {offsets = [0, 128], sizes = [1, 128], strides = [1, 1]} : vector<1x384xf32> to vector<1x128xf32>
    %153 = arith.addf %151, %152 : vector<1x128xf32>
    %154 = arith.negf %153 : vector<1x128xf32>
    %155 = math.exp %154 : vector<1x128xf32>
    %cst_68 = arith.constant 1.000000e+00 : f32
    %156 = vector.broadcast %cst_68 : f32 to vector<1x128xf32>
    %157 = arith.addf %156, %155 : vector<1x128xf32>
    %158 = arith.divf %156, %157 : vector<1x128xf32>
    %159 = vector.extract_strided_slice %142 {offsets = [0, 256], sizes = [1, 128], strides = [1, 1]} : vector<1x384xf32> to vector<1x128xf32>
    %160 = vector.extract_strided_slice %141 {offsets = [0, 256], sizes = [1, 128], strides = [1, 1]} : vector<1x384xf32> to vector<1x128xf32>
    %161 = arith.mulf %150, %160 : vector<1x128xf32>
    %162 = arith.addf %159, %161 : vector<1x128xf32>
    %163 = math.tanh %162 : vector<1x128xf32>
    %cst_69 = arith.constant 1.000000e+00 : f32
    %164 = vector.broadcast %cst_69 : f32 to vector<1x128xf32>
    %165 = arith.subf %164, %158 : vector<1x128xf32>
    %166 = arith.mulf %165, %163 : vector<1x128xf32>
    %c0_70 = arith.constant 0 : index
    %c0_71 = arith.constant 0 : index
    %167 = vector.load %arg9[%c0_70, %c0_71] : memref<8x128xf32, #tpu.memory_space<vmem>>, vector<1x128xf32>
    %168 = arith.mulf %158, %167 : vector<1x128xf32>
    %169 = arith.addf %166, %168 : vector<1x128xf32>
    %c2_72 = arith.constant 2 : index
    %c0_73 = arith.constant 0 : index
    %170 = vector.load %arg7[%c2_72, %c0_73] : memref<8x128xf32, #tpu.memory_space<vmem>>, vector<1x128xf32>
    tpu.vector_store %arg7[%c2_72, %c0_73], %169 {strides = array<i32>} : memref<8x128xf32, #tpu.memory_space<vmem>>, vector<1x128xf32>,
    %c0_74 = arith.constant 0 : index
    %c0_75 = arith.constant 0 : index
    %171 = vector.load %arg9[%c0_74, %c0_75] : memref<8x128xf32, #tpu.memory_space<vmem>>, vector<1x128xf32>
    tpu.vector_store %arg9[%c0_74, %c0_75], %169 {strides = array<i32>} : memref<8x128xf32, #tpu.memory_space<vmem>>, vector<1x128xf32>,
    %c0_76 = arith.constant 0 : index
    %c0_77 = arith.constant 0 : index
    %172 = vector.load %arg9[%c0_76, %c0_77] : memref<8x128xf32, #tpu.memory_space<vmem>>, vector<8x128xf32>
    %c0_78 = arith.constant 0 : index
    %c0_79 = arith.constant 0 : index
    %173 = vector.load %arg5[%c0_78, %c0_79] : memref<128x384xf32, #tpu.memory_space<vmem>>, vector<128x384xf32>
    %cst_80 = arith.constant dense<0.000000e+00> : vector<8x384xf32>
    %174 = tpu.matmul %172, %173, %cst_80 {dimension_numbers = #tpu.dot_dimension_numbers<[1], [0], [0], [1], [0, 0, 1, 1], [], []>} : vector<8x128xf32>, vector<128x384xf32>, vector<8x384xf32> -> vector<8x384xf32>
    %175 = vector.extract_strided_slice %174 {offsets = [0, 0], sizes = [1, 384], strides = [1, 1]} : vector<8x384xf32> to vector<1x384xf32>
    %176 = arith.addf %175, %66 : vector<1x384xf32>
    %177 = vector.extract_strided_slice %65 {offsets = [3, 0], sizes = [1, 384], strides = [1, 1]} : vector<8x384xf32> to vector<1x384xf32>
    %178 = vector.extract_strided_slice %177 {offsets = [0, 0], sizes = [1, 128], strides = [1, 1]} : vector<1x384xf32> to vector<1x128xf32>
    %179 = vector.extract_strided_slice %176 {offsets = [0, 0], sizes = [1, 128], strides = [1, 1]} : vector<1x384xf32> to vector<1x128xf32>
    %180 = arith.addf %178, %179 : vector<1x128xf32>
    %181 = arith.negf %180 : vector<1x128xf32>
    %182 = math.exp %181 : vector<1x128xf32>
    %cst_81 = arith.constant 1.000000e+00 : f32
    %183 = vector.broadcast %cst_81 : f32 to vector<1x128xf32>
    %184 = arith.addf %183, %182 : vector<1x128xf32>
    %185 = arith.divf %183, %184 : vector<1x128xf32>
    %186 = vector.extract_strided_slice %177 {offsets = [0, 128], sizes = [1, 128], strides = [1, 1]} : vector<1x384xf32> to vector<1x128xf32>
    %187 = vector.extract_strided_slice %176 {offsets = [0, 128], sizes = [1, 128], strides = [1, 1]} : vector<1x384xf32> to vector<1x128xf32>
    %188 = arith.addf %186, %187 : vector<1x128xf32>
    %189 = arith.negf %188 : vector<1x128xf32>
    %190 = math.exp %189 : vector<1x128xf32>
    %cst_82 = arith.constant 1.000000e+00 : f32
    %191 = vector.broadcast %cst_82 : f32 to vector<1x128xf32>
    %192 = arith.addf %191, %190 : vector<1x128xf32>
    %193 = arith.divf %191, %192 : vector<1x128xf32>
    %194 = vector.extract_strided_slice %177 {offsets = [0, 256], sizes = [1, 128], strides = [1, 1]} : vector<1x384xf32> to vector<1x128xf32>
    %195 = vector.extract_strided_slice %176 {offsets = [0, 256], sizes = [1, 128], strides = [1, 1]} : vector<1x384xf32> to vector<1x128xf32>
    %196 = arith.mulf %185, %195 : vector<1x128xf32>
    %197 = arith.addf %194, %196 : vector<1x128xf32>
    %198 = math.tanh %197 : vector<1x128xf32>
    %cst_83 = arith.constant 1.000000e+00 : f32
    %199 = vector.broadcast %cst_83 : f32 to vector<1x128xf32>
    %200 = arith.subf %199, %193 : vector<1x128xf32>
    %201 = arith.mulf %200, %198 : vector<1x128xf32>
    %c0_84 = arith.constant 0 : index
    %c0_85 = arith.constant 0 : index
    %202 = vector.load %arg9[%c0_84, %c0_85] : memref<8x128xf32, #tpu.memory_space<vmem>>, vector<1x128xf32>
    %203 = arith.mulf %193, %202 : vector<1x128xf32>
    %204 = arith.addf %201, %203 : vector<1x128xf32>
    %c3_86 = arith.constant 3 : index
    %c0_87 = arith.constant 0 : index
    %205 = vector.load %arg7[%c3_86, %c0_87] : memref<8x128xf32, #tpu.memory_space<vmem>>, vector<1x128xf32>
    tpu.vector_store %arg7[%c3_86, %c0_87], %204 {strides = array<i32>} : memref<8x128xf32, #tpu.memory_space<vmem>>, vector<1x128xf32>,
    %c0_88 = arith.constant 0 : index
    %c0_89 = arith.constant 0 : index
    %206 = vector.load %arg9[%c0_88, %c0_89] : memref<8x128xf32, #tpu.memory_space<vmem>>, vector<1x128xf32>
    tpu.vector_store %arg9[%c0_88, %c0_89], %204 {strides = array<i32>} : memref<8x128xf32, #tpu.memory_space<vmem>>, vector<1x128xf32>,
    %c0_90 = arith.constant 0 : index
    %c0_91 = arith.constant 0 : index
    %207 = vector.load %arg9[%c0_90, %c0_91] : memref<8x128xf32, #tpu.memory_space<vmem>>, vector<8x128xf32>
    %c0_92 = arith.constant 0 : index
    %c0_93 = arith.constant 0 : index
    %208 = vector.load %arg5[%c0_92, %c0_93] : memref<128x384xf32, #tpu.memory_space<vmem>>, vector<128x384xf32>
    %cst_94 = arith.constant dense<0.000000e+00> : vector<8x384xf32>
    %209 = tpu.matmul %207, %208, %cst_94 {dimension_numbers = #tpu.dot_dimension_numbers<[1], [0], [0], [1], [0, 0, 1, 1], [], []>} : vector<8x128xf32>, vector<128x384xf32>, vector<8x384xf32> -> vector<8x384xf32>
    %210 = vector.extract_strided_slice %209 {offsets = [0, 0], sizes = [1, 384], strides = [1, 1]} : vector<8x384xf32> to vector<1x384xf32>
    %211 = arith.addf %210, %66 : vector<1x384xf32>
    %212 = vector.extract_strided_slice %65 {offsets = [4, 0], sizes = [1, 384], strides = [1, 1]} : vector<8x384xf32> to vector<1x384xf32>
    %213 = vector.extract_strided_slice %212 {offsets = [0, 0], sizes = [1, 128], strides = [1, 1]} : vector<1x384xf32> to vector<1x128xf32>
    %214 = vector.extract_strided_slice %211 {offsets = [0, 0], sizes = [1, 128], strides = [1, 1]} : vector<1x384xf32> to vector<1x128xf32>
    %215 = arith.addf %213, %214 : vector<1x128xf32>
    %216 = arith.negf %215 : vector<1x128xf32>
    %217 = math.exp %216 : vector<1x128xf32>
    %cst_95 = arith.constant 1.000000e+00 : f32
    %218 = vector.broadcast %cst_95 : f32 to vector<1x128xf32>
    %219 = arith.addf %218, %217 : vector<1x128xf32>
    %220 = arith.divf %218, %219 : vector<1x128xf32>
    %221 = vector.extract_strided_slice %212 {offsets = [0, 128], sizes = [1, 128], strides = [1, 1]} : vector<1x384xf32> to vector<1x128xf32>
    %222 = vector.extract_strided_slice %211 {offsets = [0, 128], sizes = [1, 128], strides = [1, 1]} : vector<1x384xf32> to vector<1x128xf32>
    %223 = arith.addf %221, %222 : vector<1x128xf32>
    %224 = arith.negf %223 : vector<1x128xf32>
    %225 = math.exp %224 : vector<1x128xf32>
    %cst_96 = arith.constant 1.000000e+00 : f32
    %226 = vector.broadcast %cst_96 : f32 to vector<1x128xf32>
    %227 = arith.addf %226, %225 : vector<1x128xf32>
    %228 = arith.divf %226, %227 : vector<1x128xf32>
    %229 = vector.extract_strided_slice %212 {offsets = [0, 256], sizes = [1, 128], strides = [1, 1]} : vector<1x384xf32> to vector<1x128xf32>
    %230 = vector.extract_strided_slice %211 {offsets = [0, 256], sizes = [1, 128], strides = [1, 1]} : vector<1x384xf32> to vector<1x128xf32>
    %231 = arith.mulf %220, %230 : vector<1x128xf32>
    %232 = arith.addf %229, %231 : vector<1x128xf32>
    %233 = math.tanh %232 : vector<1x128xf32>
    %cst_97 = arith.constant 1.000000e+00 : f32
    %234 = vector.broadcast %cst_97 : f32 to vector<1x128xf32>
    %235 = arith.subf %234, %228 : vector<1x128xf32>
    %236 = arith.mulf %235, %233 : vector<1x128xf32>
    %c0_98 = arith.constant 0 : index
    %c0_99 = arith.constant 0 : index
    %237 = vector.load %arg9[%c0_98, %c0_99] : memref<8x128xf32, #tpu.memory_space<vmem>>, vector<1x128xf32>
    %238 = arith.mulf %228, %237 : vector<1x128xf32>
    %239 = arith.addf %236, %238 : vector<1x128xf32>
    %c4_100 = arith.constant 4 : index
    %c0_101 = arith.constant 0 : index
    %240 = vector.load %arg7[%c4_100, %c0_101] : memref<8x128xf32, #tpu.memory_space<vmem>>, vector<1x128xf32>
    tpu.vector_store %arg7[%c4_100, %c0_101], %239 {strides = array<i32>} : memref<8x128xf32, #tpu.memory_space<vmem>>, vector<1x128xf32>,
    %c0_102 = arith.constant 0 : index
    %c0_103 = arith.constant 0 : index
    %241 = vector.load %arg9[%c0_102, %c0_103] : memref<8x128xf32, #tpu.memory_space<vmem>>, vector<1x128xf32>
    tpu.vector_store %arg9[%c0_102, %c0_103], %239 {strides = array<i32>} : memref<8x128xf32, #tpu.memory_space<vmem>>, vector<1x128xf32>,
    %c0_104 = arith.constant 0 : index
    %c0_105 = arith.constant 0 : index
    %242 = vector.load %arg9[%c0_104, %c0_105] : memref<8x128xf32, #tpu.memory_space<vmem>>, vector<8x128xf32>
    %c0_106 = arith.constant 0 : index
    %c0_107 = arith.constant 0 : index
    %243 = vector.load %arg5[%c0_106, %c0_107] : memref<128x384xf32, #tpu.memory_space<vmem>>, vector<128x384xf32>
    %cst_108 = arith.constant dense<0.000000e+00> : vector<8x384xf32>
    %244 = tpu.matmul %242, %243, %cst_108 {dimension_numbers = #tpu.dot_dimension_numbers<[1], [0], [0], [1], [0, 0, 1, 1], [], []>} : vector<8x128xf32>, vector<128x384xf32>, vector<8x384xf32> -> vector<8x384xf32>
    %245 = vector.extract_strided_slice %244 {offsets = [0, 0], sizes = [1, 384], strides = [1, 1]} : vector<8x384xf32> to vector<1x384xf32>
    %246 = arith.addf %245, %66 : vector<1x384xf32>
    %247 = vector.extract_strided_slice %65 {offsets = [5, 0], sizes = [1, 384], strides = [1, 1]} : vector<8x384xf32> to vector<1x384xf32>
    %248 = vector.extract_strided_slice %247 {offsets = [0, 0], sizes = [1, 128], strides = [1, 1]} : vector<1x384xf32> to vector<1x128xf32>
    %249 = vector.extract_strided_slice %246 {offsets = [0, 0], sizes = [1, 128], strides = [1, 1]} : vector<1x384xf32> to vector<1x128xf32>
    %250 = arith.addf %248, %249 : vector<1x128xf32>
    %251 = arith.negf %250 : vector<1x128xf32>
    %252 = math.exp %251 : vector<1x128xf32>
    %cst_109 = arith.constant 1.000000e+00 : f32
    %253 = vector.broadcast %cst_109 : f32 to vector<1x128xf32>
    %254 = arith.addf %253, %252 : vector<1x128xf32>
    %255 = arith.divf %253, %254 : vector<1x128xf32>
    %256 = vector.extract_strided_slice %247 {offsets = [0, 128], sizes = [1, 128], strides = [1, 1]} : vector<1x384xf32> to vector<1x128xf32>
    %257 = vector.extract_strided_slice %246 {offsets = [0, 128], sizes = [1, 128], strides = [1, 1]} : vector<1x384xf32> to vector<1x128xf32>
    %258 = arith.addf %256, %257 : vector<1x128xf32>
    %259 = arith.negf %258 : vector<1x128xf32>
    %260 = math.exp %259 : vector<1x128xf32>
    %cst_110 = arith.constant 1.000000e+00 : f32
    %261 = vector.broadcast %cst_110 : f32 to vector<1x128xf32>
    %262 = arith.addf %261, %260 : vector<1x128xf32>
    %263 = arith.divf %261, %262 : vector<1x128xf32>
    %264 = vector.extract_strided_slice %247 {offsets = [0, 256], sizes = [1, 128], strides = [1, 1]} : vector<1x384xf32> to vector<1x128xf32>
    %265 = vector.extract_strided_slice %246 {offsets = [0, 256], sizes = [1, 128], strides = [1, 1]} : vector<1x384xf32> to vector<1x128xf32>
    %266 = arith.mulf %255, %265 : vector<1x128xf32>
    %267 = arith.addf %264, %266 : vector<1x128xf32>
    %268 = math.tanh %267 : vector<1x128xf32>
    %cst_111 = arith.constant 1.000000e+00 : f32
    %269 = vector.broadcast %cst_111 : f32 to vector<1x128xf32>
    %270 = arith.subf %269, %263 : vector<1x128xf32>
    %271 = arith.mulf %270, %268 : vector<1x128xf32>
    %c0_112 = arith.constant 0 : index
    %c0_113 = arith.constant 0 : index
    %272 = vector.load %arg9[%c0_112, %c0_113] : memref<8x128xf32, #tpu.memory_space<vmem>>, vector<1x128xf32>
    %273 = arith.mulf %263, %272 : vector<1x128xf32>
    %274 = arith.addf %271, %273 : vector<1x128xf32>
    %c5_114 = arith.constant 5 : index
    %c0_115 = arith.constant 0 : index
    %275 = vector.load %arg7[%c5_114, %c0_115] : memref<8x128xf32, #tpu.memory_space<vmem>>, vector<1x128xf32>
    tpu.vector_store %arg7[%c5_114, %c0_115], %274 {strides = array<i32>} : memref<8x128xf32, #tpu.memory_space<vmem>>, vector<1x128xf32>,
    %c0_116 = arith.constant 0 : index
    %c0_117 = arith.constant 0 : index
    %276 = vector.load %arg9[%c0_116, %c0_117] : memref<8x128xf32, #tpu.memory_space<vmem>>, vector<1x128xf32>
    tpu.vector_store %arg9[%c0_116, %c0_117], %274 {strides = array<i32>} : memref<8x128xf32, #tpu.memory_space<vmem>>, vector<1x128xf32>,
    %c0_118 = arith.constant 0 : index
    %c0_119 = arith.constant 0 : index
    %277 = vector.load %arg9[%c0_118, %c0_119] : memref<8x128xf32, #tpu.memory_space<vmem>>, vector<8x128xf32>
    %c0_120 = arith.constant 0 : index
    %c0_121 = arith.constant 0 : index
    %278 = vector.load %arg5[%c0_120, %c0_121] : memref<128x384xf32, #tpu.memory_space<vmem>>, vector<128x384xf32>
    %cst_122 = arith.constant dense<0.000000e+00> : vector<8x384xf32>
    %279 = tpu.matmul %277, %278, %cst_122 {dimension_numbers = #tpu.dot_dimension_numbers<[1], [0], [0], [1], [0, 0, 1, 1], [], []>} : vector<8x128xf32>, vector<128x384xf32>, vector<8x384xf32> -> vector<8x384xf32>
    %280 = vector.extract_strided_slice %279 {offsets = [0, 0], sizes = [1, 384], strides = [1, 1]} : vector<8x384xf32> to vector<1x384xf32>
    %281 = arith.addf %280, %66 : vector<1x384xf32>
    %282 = vector.extract_strided_slice %65 {offsets = [6, 0], sizes = [1, 384], strides = [1, 1]} : vector<8x384xf32> to vector<1x384xf32>
    %283 = vector.extract_strided_slice %282 {offsets = [0, 0], sizes = [1, 128], strides = [1, 1]} : vector<1x384xf32> to vector<1x128xf32>
    %284 = vector.extract_strided_slice %281 {offsets = [0, 0], sizes = [1, 128], strides = [1, 1]} : vector<1x384xf32> to vector<1x128xf32>
    %285 = arith.addf %283, %284 : vector<1x128xf32>
    %286 = arith.negf %285 : vector<1x128xf32>
    %287 = math.exp %286 : vector<1x128xf32>
    %cst_123 = arith.constant 1.000000e+00 : f32
    %288 = vector.broadcast %cst_123 : f32 to vector<1x128xf32>
    %289 = arith.addf %288, %287 : vector<1x128xf32>
    %290 = arith.divf %288, %289 : vector<1x128xf32>
    %291 = vector.extract_strided_slice %282 {offsets = [0, 128], sizes = [1, 128], strides = [1, 1]} : vector<1x384xf32> to vector<1x128xf32>
    %292 = vector.extract_strided_slice %281 {offsets = [0, 128], sizes = [1, 128], strides = [1, 1]} : vector<1x384xf32> to vector<1x128xf32>
    %293 = arith.addf %291, %292 : vector<1x128xf32>
    %294 = arith.negf %293 : vector<1x128xf32>
    %295 = math.exp %294 : vector<1x128xf32>
    %cst_124 = arith.constant 1.000000e+00 : f32
    %296 = vector.broadcast %cst_124 : f32 to vector<1x128xf32>
    %297 = arith.addf %296, %295 : vector<1x128xf32>
    %298 = arith.divf %296, %297 : vector<1x128xf32>
    %299 = vector.extract_strided_slice %282 {offsets = [0, 256], sizes = [1, 128], strides = [1, 1]} : vector<1x384xf32> to vector<1x128xf32>
    %300 = vector.extract_strided_slice %281 {offsets = [0, 256], sizes = [1, 128], strides = [1, 1]} : vector<1x384xf32> to vector<1x128xf32>
    %301 = arith.mulf %290, %300 : vector<1x128xf32>
    %302 = arith.addf %299, %301 : vector<1x128xf32>
    %303 = math.tanh %302 : vector<1x128xf32>
    %cst_125 = arith.constant 1.000000e+00 : f32
    %304 = vector.broadcast %cst_125 : f32 to vector<1x128xf32>
    %305 = arith.subf %304, %298 : vector<1x128xf32>
    %306 = arith.mulf %305, %303 : vector<1x128xf32>
    %c0_126 = arith.constant 0 : index
    %c0_127 = arith.constant 0 : index
    %307 = vector.load %arg9[%c0_126, %c0_127] : memref<8x128xf32, #tpu.memory_space<vmem>>, vector<1x128xf32>
    %308 = arith.mulf %298, %307 : vector<1x128xf32>
    %309 = arith.addf %306, %308 : vector<1x128xf32>
    %c6_128 = arith.constant 6 : index
    %c0_129 = arith.constant 0 : index
    %310 = vector.load %arg7[%c6_128, %c0_129] : memref<8x128xf32, #tpu.memory_space<vmem>>, vector<1x128xf32>
    tpu.vector_store %arg7[%c6_128, %c0_129], %309 {strides = array<i32>} : memref<8x128xf32, #tpu.memory_space<vmem>>, vector<1x128xf32>,
    %c0_130 = arith.constant 0 : index
    %c0_131 = arith.constant 0 : index
    %311 = vector.load %arg9[%c0_130, %c0_131] : memref<8x128xf32, #tpu.memory_space<vmem>>, vector<1x128xf32>
    tpu.vector_store %arg9[%c0_130, %c0_131], %309 {strides = array<i32>} : memref<8x128xf32, #tpu.memory_space<vmem>>, vector<1x128xf32>,
    %c0_132 = arith.constant 0 : index
    %c0_133 = arith.constant 0 : index
    %312 = vector.load %arg9[%c0_132, %c0_133] : memref<8x128xf32, #tpu.memory_space<vmem>>, vector<8x128xf32>
    %c0_134 = arith.constant 0 : index
    %c0_135 = arith.constant 0 : index
    %313 = vector.load %arg5[%c0_134, %c0_135] : memref<128x384xf32, #tpu.memory_space<vmem>>, vector<128x384xf32>
    %cst_136 = arith.constant dense<0.000000e+00> : vector<8x384xf32>
    %314 = tpu.matmul %312, %313, %cst_136 {dimension_numbers = #tpu.dot_dimension_numbers<[1], [0], [0], [1], [0, 0, 1, 1], [], []>} : vector<8x128xf32>, vector<128x384xf32>, vector<8x384xf32> -> vector<8x384xf32>
    %315 = vector.extract_strided_slice %314 {offsets = [0, 0], sizes = [1, 384], strides = [1, 1]} : vector<8x384xf32> to vector<1x384xf32>
    %316 = arith.addf %315, %66 : vector<1x384xf32>
    %317 = vector.extract_strided_slice %65 {offsets = [7, 0], sizes = [1, 384], strides = [1, 1]} : vector<8x384xf32> to vector<1x384xf32>
    %318 = vector.extract_strided_slice %317 {offsets = [0, 0], sizes = [1, 128], strides = [1, 1]} : vector<1x384xf32> to vector<1x128xf32>
    %319 = vector.extract_strided_slice %316 {offsets = [0, 0], sizes = [1, 128], strides = [1, 1]} : vector<1x384xf32> to vector<1x128xf32>
    %320 = arith.addf %318, %319 : vector<1x128xf32>
    %321 = arith.negf %320 : vector<1x128xf32>
    %322 = math.exp %321 : vector<1x128xf32>
    %cst_137 = arith.constant 1.000000e+00 : f32
    %323 = vector.broadcast %cst_137 : f32 to vector<1x128xf32>
    %324 = arith.addf %323, %322 : vector<1x128xf32>
    %325 = arith.divf %323, %324 : vector<1x128xf32>
    %326 = vector.extract_strided_slice %317 {offsets = [0, 128], sizes = [1, 128], strides = [1, 1]} : vector<1x384xf32> to vector<1x128xf32>
    %327 = vector.extract_strided_slice %316 {offsets = [0, 128], sizes = [1, 128], strides = [1, 1]} : vector<1x384xf32> to vector<1x128xf32>
    %328 = arith.addf %326, %327 : vector<1x128xf32>
    %329 = arith.negf %328 : vector<1x128xf32>
    %330 = math.exp %329 : vector<1x128xf32>
    %cst_138 = arith.constant 1.000000e+00 : f32
    %331 = vector.broadcast %cst_138 : f32 to vector<1x128xf32>
    %332 = arith.addf %331, %330 : vector<1x128xf32>
    %333 = arith.divf %331, %332 : vector<1x128xf32>
    %334 = vector.extract_strided_slice %317 {offsets = [0, 256], sizes = [1, 128], strides = [1, 1]} : vector<1x384xf32> to vector<1x128xf32>
    %335 = vector.extract_strided_slice %316 {offsets = [0, 256], sizes = [1, 128], strides = [1, 1]} : vector<1x384xf32> to vector<1x128xf32>
    %336 = arith.mulf %325, %335 : vector<1x128xf32>
    %337 = arith.addf %334, %336 : vector<1x128xf32>
    %338 = math.tanh %337 : vector<1x128xf32>
    %cst_139 = arith.constant 1.000000e+00 : f32
    %339 = vector.broadcast %cst_139 : f32 to vector<1x128xf32>
    %340 = arith.subf %339, %333 : vector<1x128xf32>
    %341 = arith.mulf %340, %338 : vector<1x128xf32>
    %c0_140 = arith.constant 0 : index
    %c0_141 = arith.constant 0 : index
    %342 = vector.load %arg9[%c0_140, %c0_141] : memref<8x128xf32, #tpu.memory_space<vmem>>, vector<1x128xf32>
    %343 = arith.mulf %333, %342 : vector<1x128xf32>
    %344 = arith.addf %341, %343 : vector<1x128xf32>
    %c7_142 = arith.constant 7 : index
    %c0_143 = arith.constant 0 : index
    %345 = vector.load %arg7[%c7_142, %c0_143] : memref<8x128xf32, #tpu.memory_space<vmem>>, vector<1x128xf32>
    tpu.vector_store %arg7[%c7_142, %c0_143], %344 {strides = array<i32>} : memref<8x128xf32, #tpu.memory_space<vmem>>, vector<1x128xf32>,
    %c0_144 = arith.constant 0 : index
    %c0_145 = arith.constant 0 : index
    %346 = vector.load %arg9[%c0_144, %c0_145] : memref<8x128xf32, #tpu.memory_space<vmem>>, vector<1x128xf32>
    tpu.vector_store %arg9[%c0_144, %c0_145], %344 {strides = array<i32>} : memref<8x128xf32, #tpu.memory_space<vmem>>, vector<1x128xf32>,
    return
  }
  func.func @transform_0(%arg0: i32, %arg1: memref<8xi32, #tpu.memory_space<smem>>) -> (i32, i32, i32) {
    %c0_i32 = arith.constant 0 : i32
    %c0_i32_0 = arith.constant 0 : i32
    %c0_i32_1 = arith.constant 0 : i32
    %c0_i32_2 = arith.constant 0 : i32
    return %c0_i32, %c0_i32_0, %c0_i32_1 : i32, i32, i32
  }
  func.func @transform_1(%arg0: i32, %arg1: memref<8xi32, #tpu.memory_space<smem>>) -> (i32, i32) {
    %c0_i32 = arith.constant 0 : i32
    %c0_i32_0 = arith.constant 0 : i32
    %c0_i32_1 = arith.constant 0 : i32
    return %c0_i32, %c0_i32_0 : i32, i32
  }
  func.func @transform_2(%arg0: i32, %arg1: memref<8xi32, #tpu.memory_space<smem>>) -> (i32, i32) {
    %c0_i32 = arith.constant 0 : i32
    %c0_i32_0 = arith.constant 0 : i32
    %c0_i32_1 = arith.constant 0 : i32
    return %c0_i32, %c0_i32_0 : i32, i32
  }
  func.func @transform_3(%arg0: i32, %arg1: memref<8xi32, #tpu.memory_space<smem>>) -> (i32, i32) {
    %c0_i32 = arith.constant 0 : i32
    %c0_i32_0 = arith.constant 0 : i32
    %c0_i32_1 = arith.constant 0 : i32
    return %c0_i32, %c0_i32_0 : i32, i32
  }
  func.func @transform_4(%arg0: i32, %arg1: memref<8xi32, #tpu.memory_space<smem>>) -> (i32, i32) {
    %c0_i32 = arith.constant 0 : i32
    %c0_i32_0 = arith.constant 0 : i32
    %c0_i32_1 = arith.constant 0 : i32
    return %c0_i32, %c0_i32_0 : i32, i32
  }
  func.func @transform_5(%arg0: i32, %arg1: memref<8xi32, #tpu.memory_space<smem>>) -> (i32, i32) {
    %c0_i32 = arith.constant 0 : i32
    %c0_i32_0 = arith.constant 0 : i32
    return %arg0, %c0_i32 : i32, i32
  }
}

</mosaic_0001>

<bundles_post_ra>
// kernel: tpu_custom_call.1
= control target key start
LH: loop header
LB: loop body
LE: loop exit
PB: predicated region body
PF: predicated region fallthrough
CT: control target
= control target key end

     0   :  { %s2862_s21 = smov [#allocation5]   ;;  %s3768_s0 = inlined_call_operand.hbm [shape: s32[8], index: 0, kind: input, shape index: {}]   ;;  %s3769_s1 = inlined_call_operand.hbm [shape: f32[16,1,128], index: 1, kind: input, shape index: {}]   ;;  %s3770_s2 = inlined_call_operand.vmem [shape: f32[1,128], index: 2, kind: input, shape index: {}]   ;;  %s3771_s3 = inlined_call_operand.hbm [shape: f32[128,384], index: 3, kind: input, shape index: {}]   ;;  %s3772_s4 = inlined_call_operand.hbm [shape: f32[128,384], index: 4, kind: input, shape index: {}]   ;;  %s3773_s5 = inlined_call_operand.vmem [shape: f32[2,384], index: 5, kind: input, shape index: {}]   ;;  %s3774_s6 = inlined_call_operand.hbm [shape: f32[8,128], index: 6, kind: output, shape index: {}]  }
   0x1   :  { %12 = dma.hbm_to_smem %s3768_s0, 16, %s2862_s21, [#allocation4] }
   0x2   :  { %2854 = dma.done.wait [#allocation4], 16 }
   0x3   :  { %2855 = vsyncadd [#allocation4], 4294967280 }
   0x4   :  { %14 = sfence }
   0x5   :  { %15 = vsyncpa [#allocation7], 0 }
   0x6   :  { %16 = vsyncpa [#allocation10], 0 }
   0x7   :  { %17 = vsyncpa [#allocation8], 0  ;;  %s2863_s24 = smov [#allocation9]  }
   0x8   :  { %s37_s25 = sshll.u32 %s2863_s24, 4  ;;  %s38_s25 = int_to_ptr.vmem [resolvable:$true] %s37_s25 }
   0x9   :  { %s2782_s26 = scalar_lea.vmem %s38_s25, 6144  ;;  %p2787_p1 = scmp.lt.s32.totalorder %s38_s25, %s38_s25 }
   0xa   :  { %p2783_p0 = scmp.ne.s32.totalorder %s38_s25, %s2782_s26  ;;  %p2788_p2 = scmp.lt.s32.totalorder %s2782_s26, %s2782_s26 }
   0xc   :  { %p2789_p3 = por %p2788_p2, %p2787_p1 }
   0xe   :  { %p2790_p4 = pnand %p2789_p3, %p2783_p0 }
  0x10   :  { %2793 = shalt.err (!%p2790_p4)
}
  0x11   :  { %s2864_s27 = smov 384   ;;  %s2865_s28 = smov 24  }
  0x12   :  { %43 = dma.hbm_to_vmem [thread:$0]  %s3771_s3, 6144, %s38_s25, [#allocation10], %s2864_s27, %s2864_s27, %s2865_s28  }
  0x13   :  { %s2866_s30 = smov [#allocation6]  }
  0x14   :  { %s23_s7 = sshll.u32 %s2866_s30, 4  ;;  %s24_s7 = int_to_ptr.vmem [resolvable:$true] %s23_s7 }
  0x15   :  { %s2802_s8 = scalar_lea.vmem %s24_s7, 256  ;;  %p2807_p6 = scmp.lt.s32.totalorder %s24_s7, %s24_s7 }
  0x16   :  { %p2803_p5 = scmp.ne.s32.totalorder %s24_s7, %s2802_s8  ;;  %p2808_p7 = scmp.lt.s32.totalorder %s2802_s8, %s2802_s8 }
  0x18   :  { %p2809_p8 = por %p2808_p7, %p2807_p6 }
  0x1a   :  { %p2810_p9 = pnand %p2809_p8, %p2803_p5 }
  0x1c   :  { %2813 = shalt.err (!%p2810_p9)
}
  0x1d   :  { %s2867_s9 = smov 16   ;;  %s2868_s10 = smov 1  }
  0x1e   :  { %29 = dma.hbm_to_vmem [thread:$0]  %s3769_s1, 256, %s24_s7, [#allocation7], %s2867_s9, %s2867_s9, %s2868_s10  }
  0x1f   :  { %s2869_s13 = smov [#allocation11]  }
  0x20   :  { %s49_s14 = sshll.u32 %s2869_s13, 4  ;;  %s50_s14 = int_to_ptr.vmem [resolvable:$true] %s49_s14 }
  0x21   :  { %s2822_s3 = scalar_lea.vmem %s50_s14, 6144  ;;  %p2827_p11 = scmp.lt.s32.totalorder %s50_s14, %s50_s14 }
  0x22   :  { %p2823_p10 = scmp.ne.s32.totalorder %s50_s14, %s2822_s3  ;;  %p2828_p12 = scmp.lt.s32.totalorder %s2822_s3, %s2822_s3 }
  0x24   :  { %p2829_p13 = por %p2828_p12, %p2827_p11 }
  0x26   :  { %p2830_p0 = pnand %p2829_p13, %p2823_p10 }
  0x28   :  { %2833 = shalt.err (!%p2830_p0)
}
  0x29   :  { %55 = dma.hbm_to_vmem [thread:$0]  %s3772_s4, 6144, %s50_s14, [#allocation10], %s2864_s27, %s2864_s27, %s2865_s28  }
  0x2a   :  { %2856 = dma.done.wait [#allocation7], 256  }
  0x2b   :  { %2857 = vsyncadd [#allocation7], 4294967040 }
  0x2c   :  { %2858 = dma.done.wait [#allocation10], 12288  }
  0x2d   :  { %2859 = vsyncadd [#allocation10], 4294955008  ;;  %v3775_v0 = vmov 0.0   ;;  %s2923_s1 = sld [smem:[#allocation5]]  ;;  %vm2871_vm0 = vmmov 0   ;;  %v161_v1 = vld [vmem:[#allocation9 + $0x170] sm:$0xff] }
  0x2e   :  { %244 = vmatprep.mubr.f32.mxu0 %v3775_v0  ;;  %71 = vst [vmem:[#allocation3] sm:$0xff] %v3775_v0  ;;  %2360 = vmatprep.subr.mxu1 %v3775_v0  ;;  %s2927_s17 = sld [smem:[#allocation5 + $0x1]]  ;;  %v160_v2 = vld [vmem:[#allocation9 + $0x168] sm:$0xff]  ;;  %v158_v3 = vld [vmem:[#allocation9 + $0x158] sm:$0xff]  ;;  %v157_v4 = vld [vmem:[#allocation9 + $0x150] sm:$0xff] }
  0x2f   :  { %2392 = vmatprep.mubr.msk.f32.mxu1 %vm2871_vm0, %v3775_v0  ;;  %s2929_s4 = sld [smem:[#allocation5 + $0x2]]  ;;  %180 = vmatprep.subr.mxu0 %v161_v1  ;;  %v155_v5 = vld [vmem:[#allocation9 + $0x140] sm:$0xff]  ;;  %v154_v6 = vld [vmem:[#allocation9 + $0x138] sm:$0xff]  ;;  %v152_v7 = vld [vmem:[#allocation9 + $0x128] sm:$0xff] }
  0x30   :  { %s2931_s18 = sld [smem:[#allocation5 + $0x3]]  ;;  %181 = vmatpush1.msra.mxu0 %v160_v2  ;;  %v151_v8 = vld [vmem:[#allocation9 + $0x120] sm:$0xff]  ;;  %v149_v9 = vld [vmem:[#allocation9 + $0x110] sm:$0xff]  ;;  %v148_v10 = vld [vmem:[#allocation9 + $0x108] sm:$0xff] }
  0x31   :  { %s2933_s19 = sld [smem:[#allocation5 + $0x4]]  ;;  %182 = vmatprep.subr.mxu0 %v158_v3  ;;  %v146_v11 = vld [vmem:[#allocation9 + $0xf8] sm:$0xff]  ;;  %v145_v12 = vld [vmem:[#allocation9 + $0xf0] sm:$0xff]  ;;  %v143_v13 = vld [vmem:[#allocation9 + $0xe0] sm:$0xff] }
  0x32   :  { %s2935_s20 = sld [smem:[#allocation5 + $0x5]]  ;;  %183 = vmatpush1.msra.mxu0 %v157_v4  ;;  %v142_v14 = vld [vmem:[#allocation9 + $0xd8] sm:$0xff]  ;;  %v140_v15 = vld [vmem:[#allocation9 + $0xc8] sm:$0xff]  ;;  %v139_v23 = vld [vmem:[#allocation9 + $0xc0] sm:$0xff] }
  0x33   :  { %s2937_s21 = sld [smem:[#allocation5 + $0x6]]  ;;  %184 = vmatprep.subr.mxu0 %v155_v5  ;;  %s76_s23 = scalar_lea.vmem [#allocation6], %s2923_s1  ;;  %v162_v25 = vld [vmem:[#allocation9 + $0x178] sm:$0xff]  ;;  %v137_v26 = vld [vmem:[#allocation9 + $0xb0] sm:$0xff]  ;;  %v159_v27 = vld [vmem:[#allocation9 + $0x160] sm:$0xff] }
  0x34   :  { %s2939_s22 = sld [smem:[#allocation5 + $0x7]]  ;;  %185 = vmatpush1.msra.mxu0 %v154_v6  ;;  %v77_v16 = vld [vmem:[%s76_s23] sm:$0x1]  ;;  %s81_s24 = scalar_lea.vmem [#allocation6], %s2927_s17  ;;  %2361 = vmatpush3.msra.mxu1 %v162_v25  ;;  %v136_v28 = vld [vmem:[#allocation9 + $0xa8] sm:$0xff]  ;;  %v133_v31 = vld [vmem:[#allocation9 + $0x90] sm:$0xff] }
  0x35   :  { %186 = vmatprep.subr.mxu0 %v152_v7  ;;  %78 = vst [vmem:[#allocation2] sm:$0x1] %v77_v16  ;;  %v82_v17 = vld [vmem:[%s81_s24] sm:$0x1]  ;;  %s86_s25 = scalar_lea.vmem [#allocation6], %s2929_s4  ;;  %2362 = vmatprep.subr.mxu1 %v3775_v0  ;;  %v156_v29 = vld [vmem:[#allocation9 + $0x148] sm:$0xff] }
  0x36   :  { %187 = vmatpush1.msra.mxu0 %v151_v8  ;;  %v87_v18 = vld [vmem:[%s86_s25] sm:$0x1]  ;;  %s91_s26 = scalar_lea.vmem [#allocation6], %s2931_s18  ;;  %83 = vst [vmem:[#allocation2 + $0x1] sm:$0x1] %v82_v17  ;;  %2363 = vmatpush3.msra.mxu1 %v159_v27  ;;  %v153_v32 = vld [vmem:[#allocation9 + $0x130] sm:$0xff] }
  0x37   :  { %188 = vmatprep.subr.mxu0 %v149_v9  ;;  %v92_v19 = vld [vmem:[%s91_s26] sm:$0x1]  ;;  %88 = vst [vmem:[#allocation2 + $0x2] sm:$0x1] %v87_v18  ;;  %s96_s27 = scalar_lea.vmem [#allocation6], %s2933_s19  ;;  %2364 = vmatprep.subr.mxu1 %v3775_v0  ;;  %v131_v33 = vld [vmem:[#allocation9 + $0x80] sm:$0xff] }
  0x38   :  { %189 = vmatpush1.msra.mxu0 %v148_v10  ;;  %93 = vst [vmem:[#allocation2 + $0x3] sm:$0x1] %v92_v19  ;;  %v97_v20 = vld [vmem:[%s96_s27] sm:$0x1]  ;;  %s101_s28 = scalar_lea.vmem [#allocation6], %s2935_s20  ;;  %2365 = vmatpush3.msra.mxu1 %v156_v29  ;;  %v128_v36 = vld [vmem:[#allocation9 + $0x68] sm:$0xff] }
  0x39   :  { %190 = vmatprep.subr.mxu0 %v146_v11  ;;  %v102_v21 = vld [vmem:[%s101_s28] sm:$0x1]  ;;  %s106_s29 = scalar_lea.vmem [#allocation6], %s2937_s21  ;;  %98 = vst [vmem:[#allocation2 + $0x4] sm:$0x1] %v97_v20  ;;  %2366 = vmatprep.subr.mxu1 %v3775_v0  ;;  %v127_v37 = vld [vmem:[#allocation9 + $0x60] sm:$0xff] }
  0x3a   :  { %191 = vmatpush1.msra.mxu0 %v145_v12  ;;  %v107_v22 = vld [vmem:[%s106_s29] sm:$0x1]  ;;  %103 = vst [vmem:[#allocation2 + $0x5] sm:$0x1] %v102_v21  ;;  %s111_s0 = scalar_lea.vmem [#allocation6], %s2939_s22  ;;  %2367 = vmatpush3.msra.mxu1 %v153_v32  ;;  %v147_v38 = vld [vmem:[#allocation9 + $0x100] sm:$0xff] }
  0x3b   :  { %192 = vmatprep.subr.mxu0 %v143_v13  ;;  %108 = vst [vmem:[#allocation2 + $0x6] sm:$0x1] %v107_v22  ;;  %v112_v24 = vld [vmem:[%s111_s0] sm:$0x1]  ;;  %2368 = vmatprep.subr.mxu1 %v3775_v0  ;;  %v125_v39 = vld [vmem:[#allocation9 + $0x50] sm:$0xff]  ;;  %v124_v40 = vld [vmem:[#allocation9 + $0x48] sm:$0xff] }
  0x3c   :  { %193 = vmatpush1.msra.mxu0 %v142_v14  ;;  %113 = vst [vmem:[#allocation2 + $0x7] sm:$0x1] %v112_v24  ;;  %v134_v30 = vld [vmem:[#allocation9 + $0x98] sm:$0xff]  ;;  %v144_v41 = vld [vmem:[#allocation9 + $0xe8] sm:$0xff]  ;;  %v121_v43 = vld [vmem:[#allocation9 + $0x30] sm:$0xff] }
  0x3d   :  { %194 = vmatprep.subr.mxu0 %v140_v15  ;;  %v130_v34 = vld [vmem:[#allocation9 + $0x78] sm:$0xff]  ;;  %v141_v44 = vld [vmem:[#allocation9 + $0xd0] sm:$0xff]  ;;  %v119_v45 = vld [vmem:[#allocation9 + $0x20] sm:$0xff] }
  0x3e   :  { %195 = vmatpush1.msra.mxu0 %v139_v23  ;;  %v150_v35 = vld [vmem:[#allocation9 + $0x118] sm:$0xff]  ;;  %v116_v48 = vld [vmem:[#allocation9 + $0x8] sm:$0xff]  ;;  %v115_v49 = vld [vmem:[#allocation9] sm:$0xff] }
  0x3f   :  { %196 = vmatprep.subr.mxu0 %v137_v26  ;;  %2369 = vmatpush3.msra.mxu1 %v150_v35  ;;  %v122_v42 = vld [vmem:[#allocation9 + $0x38] sm:$0xff]  ;;  %v135_v50 = vld [vmem:[#allocation9 + $0xa0] sm:$0xff]  ;;  %v2962_v53 = vld [vmem:[#allocation11 + $0x170] sm:$0xff] }
  0x40   :  { %197 = vmatpush1.msra.mxu0 %v136_v28  ;;  %2370 = vmatprep.subr.mxu1 %v3775_v0  ;;  %v118_v46 = vld [vmem:[#allocation9 + $0x18] sm:$0xff]  ;;  %3807 = vst [vmem:[#allocation17_spill] sm:$0xff] %v2962_v53  ;;  %v2964_v54 = vld [vmem:[#allocation11 + $0x168] sm:$0xff]  ;;  %v2971_v57 = vld [vmem:[#allocation11 + $0x150] sm:$0xff] }
  0x41   :  { %198 = vmatprep.subr.mxu0 %v134_v30  ;;  %2371 = vmatpush3.msra.mxu1 %v147_v38  ;;  %v138_v47 = vld [vmem:[#allocation9 + $0xb8] sm:$0xff]  ;;  %v132_v56 = vld [vmem:[#allocation9 + $0x88] sm:$0xff]  ;;  %v2974_v58 = vld [vmem:[#allocation11 + $0x140] sm:$0xff] }
  0x42   :  { %199 = vmatpush1.msra.mxu0 %v133_v31  ;;  %2372 = vmatprep.subr.mxu1 %v3775_v0  ;;  %v72_v51 = vld [vmem:[%s3770_s2] sm:$0x1]  ;;  %v129_v59 = vld [vmem:[#allocation9 + $0x70] sm:$0xff]  ;;  %v2981_v61 = vld [vmem:[#allocation11 + $0x128] sm:$0xff] }
  0x43   :  { %200 = vmatprep.subr.mxu0 %v131_v33  ;;  %2373 = vmatpush3.msra.mxu1 %v144_v41  ;;  %v2960_v52 = vld [vmem:[#allocation2] sm:$0xff]  ;;  %73 = vst [vmem:[#allocation3] sm:$0x1] %v72_v51  ;;  %v2967_v55 = vld [vmem:[#allocation11 + $0x158] sm:$0xff]  ;;  %v2988_v1 = vld [vmem:[#allocation11 + $0x110] sm:$0xff] }
  0x44   :  { %201 = vmatpush1.msra.mxu0 %v130_v34  ;;  %2374 = vmatprep.subr.mxu1 %v3775_v0  ;;  %v2978_v60 = vld [vmem:[#allocation11 + $0x138] sm:$0xff]  ;;  %v2985_v63 = vld [vmem:[#allocation11 + $0x120] sm:$0xff]  ;;  %v2992_v3 = vld [vmem:[#allocation11 + $0x108] sm:$0xff] }
  0x45   :  { %202 = vmatprep.subr.mxu0 %v128_v36  ;;  %2375 = vmatpush3.msra.mxu1 %v141_v44  ;;  %v126_v62 = vld [vmem:[#allocation9 + $0x58] sm:$0xff]  ;;  %v123_v2 = vld [vmem:[#allocation9 + $0x40] sm:$0xff]  ;;  %v120_v5 = vld [vmem:[#allocation9 + $0x28] sm:$0xff] }
  0x46   :  { %203 = vmatpush1.msra.mxu0 %v127_v37  ;;  %2376 = vmatprep.subr.mxu1 %v3775_v0  ;;  %v2995_v4 = vld [vmem:[#allocation11 + $0xf8] sm:$0xff]  ;;  %v2999_v6 = vld [vmem:[#allocation11 + $0xf0] sm:$0xff]  ;;  %v3002_v7 = vld [vmem:[#allocation11 + $0xe0] sm:$0xff] }
  0x47   :  { %204 = vmatprep.subr.mxu0 %v125_v39  ;;  %2377 = vmatpush3.msra.mxu1 %v138_v47  ;;  %v117_v8 = vld [vmem:[#allocation9 + $0x10] sm:$0xff]  ;;  %v3006_v9 = vld [vmem:[#allocation11 + $0xd8] sm:$0xff]  ;;  %v3009_v10 = vld [vmem:[#allocation11 + $0xc8] sm:$0xff] }
  0x48   :  { %205 = vmatpush1.msra.mxu0 %v124_v40  ;;  %2378 = vmatprep.subr.mxu1 %v3775_v0  ;;  %v3013_v11 = vld [vmem:[#allocation11 + $0xc0] sm:$0xff]  ;;  %v3016_v12 = vld [vmem:[#allocation11 + $0xb0] sm:$0xff]  ;;  %v3019_v13 = vld [vmem:[#allocation11 + $0x178] sm:$0xff] }
  0x49   :  { %206 = vmatprep.subr.mxu0 %v122_v42  ;;  %2379 = vmatpush3.msra.mxu1 %v135_v50  ;;  %v3022_v14 = vld [vmem:[#allocation11 + $0xa8] sm:$0xff]  ;;  %v3026_v15 = vld [vmem:[#allocation11 + $0x98] sm:$0xff]  ;;  %v3029_v16 = vld [vmem:[#allocation11 + $0x160] sm:$0xff] }
  0x4a   :  { %207 = vmatpush1.msra.mxu0 %v121_v43  ;;  %2380 = vmatprep.subr.mxu1 %v3775_v0  ;;  %v3032_v17 = vld [vmem:[#allocation11 + $0x90] sm:$0xff]  ;;  %v3036_v18 = vld [vmem:[#allocation11 + $0x80] sm:$0xff]  ;;  %v3039_v19 = vld [vmem:[#allocation11 + $0x148] sm:$0xff] }
  0x4b   :  { %208 = vmatprep.subr.mxu0 %v119_v45  ;;  %2381 = vmatpush3.msra.mxu1 %v132_v56  ;;  %v3042_v20 = vld [vmem:[#allocation11 + $0x78] sm:$0xff]  ;;  %v3046_v21 = vld [vmem:[#allocation11 + $0x68] sm:$0xff]  ;;  %v3049_v22 = vld [vmem:[#allocation11 + $0x130] sm:$0xff] }
  0x4c   :  { %209 = vmatpush1.msra.mxu0 %v118_v46  ;;  %2382 = vmatprep.subr.mxu1 %v3775_v0  ;;  %v3052_v23 = vld [vmem:[#allocation11 + $0x60] sm:$0xff]  ;;  %v3056_v24 = vld [vmem:[#allocation11 + $0x50] sm:$0xff]  ;;  %v3059_v25 = vld [vmem:[#allocation11 + $0x118] sm:$0xff]  ;;  %v165_v46 = vlaneseq }
  0x4d   :  { %210 = vmatprep.subr.mxu0 %v116_v48  ;;  %2383 = vmatpush3.msra.mxu1 %v129_v59  ;;  %v3062_v26 = vld [vmem:[#allocation11 + $0x48] sm:$0xff]  ;;  %v3066_v27 = vld [vmem:[#allocation11 + $0x38] sm:$0xff]  ;;  %v3069_v28 = vld [vmem:[#allocation11 + $0x100] sm:$0xff] }
  0x4e   :  { %211 = vmatpush1.msra.mxu0 %v115_v49  ;;  %2384 = vmatprep.subr.mxu1 %v3775_v0  ;;  %v3072_v29 = vld [vmem:[#allocation11 + $0x30] sm:$0xff]  ;;  %v3076_v30 = vld [vmem:[#allocation11 + $0x20] sm:$0xff]  ;;  %v3079_v31 = vld [vmem:[#allocation11 + $0xe8] sm:$0xff]  ;;  %v166_v48 = vshrl.u32 %v165_v46, 7 }
  0x4f   :  { %245 = vmatmul.mubr.f32.vlgmr.msra.gmra.mxu0 %v2960_v52  ;;  %372 = vmatprep.subr.mxu0 %v2962_v53  ;;  %3808 = vst [vmem:[#allocation18_spill] sm:$0xff] %v3076_v30  ;;  %v3082_v32 = vld [vmem:[#allocation11 + $0x18] sm:$0xff]  ;;  %v3086_v33 = vld [vmem:[#allocation11 + $0x8] sm:$0xff]  ;;  %v3089_v34 = vld [vmem:[#allocation11 + $0xd0] sm:$0xff] }
  0x50   :  { %373 = vmatpush1.msra.mxu0 %v2964_v54  ;;  %2385 = vmatpush3.msra.mxu1 %v126_v62  ;;  %3809 = vst [vmem:[#allocation19_spill] sm:$0xff] %v3082_v32  ;;  %3810 = vst [vmem:[#allocation20_spill] sm:$0xff] %v3086_v33  ;;  %v3092_v35 = vld [vmem:[#allocation11] sm:$0xff]  ;;  %v323_v36 = vld [vmem:[#allocation3] sm:$0xff]  ;;  %v167_v49 = vsub.s32 0, %v166_v48 }
  0x51   :  { %374 = vmatprep.subr.mxu0 %v2967_v55  ;;  %2386 = vmatprep.subr.mxu1 %v3775_v0  ;;  %3811 = vst [vmem:[#allocation21_spill] sm:$0xff] %v3092_v35  ;;  %v3097_v37 = vld [vmem:[#allocation11 + $0xb8] sm:$0xff]  ;;  %v3103_v38 = vld [vmem:[#allocation11 + $0xa0] sm:$0xff]  ;;  %v3107_v39 = vld [vmem:[#allocation11 + $0x88] sm:$0xff] }
  0x52   :  { %375 = vmatpush1.msra.mxu0 %v2971_v57  ;;  %2387 = vmatpush3.msra.mxu1 %v123_v2  ;;  %v3114_v40 = vld [vmem:[#allocation11 + $0x70] sm:$0xff]  ;;  %v3120_v41 = vld [vmem:[#allocation11 + $0x58] sm:$0xff]  ;;  %v3126_v42 = vld [vmem:[#allocation11 + $0x40] sm:$0xff]  ;;  %v171_v2 = vsub.s32 1, %v166_v48 }
  0x53   :  { %376 = vmatprep.subr.mxu0 %v2974_v58  ;;  %2388 = vmatprep.subr.mxu1 %v3775_v0  ;;  %v3132_v43 = vld [vmem:[#allocation11 + $0x28] sm:$0xff]  ;;  %v3138_v44 = vld [vmem:[#allocation11 + $0x10] sm:$0xff]  ;;  %v163_v50 = vld [vmem:[%s3773_s5] ss:$2 sm:$0x7] }
  0x54   :  { %377 = vmatpush1.msra.mxu0 %v2978_v60  ;;  %2389 = vmatpush3.msra.mxu1 %v120_v5  ;;  %3812 = vst [vmem:[#allocation22_spill] sm:$0xff] %v3132_v43  ;;  %3813 = vst [vmem:[#allocation23_spill] sm:$0xff] %v3138_v44  ;;  %v168_v56 = vrot.slane %v163_v50, %v167_v49 }
  0x55   :  { %378 = vmatprep.subr.mxu0 %v2981_v61  ;;  %2390 = vmatprep.subr.mxu1 %v3775_v0 }
  0x56   :  { %379 = vmatpush1.msra.mxu0 %v2985_v63  ;;  %2391 = vmatpush3.msra.mxu1 %v117_v8 }
  0x57   :  { %380 = vmatprep.subr.mxu0 %v2988_v1  ;;  %436 = vmatprep.mubr.f32.mxu0 %v3775_v0 }
  0x58   :  { %381 = vmatpush1.msra.mxu0 %v2992_v3  ;;  %2395 = vmatprep.subr.mxu1 %v3775_v0 }
  0x59   :  { %382 = vmatprep.subr.mxu0 %v2995_v4  ;;  %2393 = vmatmul.mubr.f32.vlgmr.msra.gmra.mxu1 %v2960_v52  ;;  %v2190_v52 = vld [vmem:[%s3773_s5 + $0x1] ss:$2 sm:$0x7]  ;;  %s2872_s5 = smov [#allocation12]  }
  0x5a   :  { %383 = vmatpush1.msra.mxu0 %v2999_v6  ;;  %2396 = vmatpush3.msra.mxu1 %v3019_v13  ;;  %v3209_v59 = vrot.slane %v2190_v52, %v167_v49  ;;  %s2165_s11 = sshll.u32 %s2872_s5, 4  ;;  %s2166_s11 = int_to_ptr.vmem [resolvable:$true] %s2165_s11 }
  0x5b   :  { %384 = vmatprep.subr.mxu0 %v3002_v7  ;;  %2397 = vmatprep.subr.mxu1 %v3775_v0  ;;  %s2834_s12 = scalar_lea.vmem %s2166_s11, 128  ;;  %p2839_p2 = scmp.lt.s32.totalorder %s2166_s11, %s2166_s11 }
  0x5c   :  { %385 = vmatpush1.msra.mxu0 %v3006_v9  ;;  %2398 = vmatpush3.msra.mxu1 %v3029_v16  ;;  %3814 = vst [vmem:[#allocation24_spill] sm:$0xff] %v3209_v59  ;;  %p2835_p1 = scmp.ne.s32.totalorder %s2166_s11, %s2834_s12  ;;  %p2840_p3 = scmp.lt.s32.totalorder %s2834_s12, %s2834_s12 }
  0x5d   :  { %386 = vmatprep.subr.mxu0 %v3009_v10  ;;  %2399 = vmatprep.subr.mxu1 %v3775_v0 }
  0x5e   :  { %387 = vmatpush1.msra.mxu0 %v3013_v11  ;;  %2400 = vmatpush3.msra.mxu1 %v3039_v19  ;;  %p2841_p4 = por %p2840_p3, %p2839_p2 }
  0x5f   :  { %388 = vmatprep.subr.mxu0 %v3016_v12  ;;  %2401 = vmatprep.subr.mxu1 %v3775_v0 }
  0x60   :  { %389 = vmatpush1.msra.mxu0 %v3022_v14  ;;  %2402 = vmatpush3.msra.mxu1 %v3049_v22  ;;  %p2842_p5 = pnand %p2841_p4, %p2835_p1 }
  0x61   :  { %390 = vmatprep.subr.mxu0 %v3026_v15  ;;  %2403 = vmatprep.subr.mxu1 %v3775_v0 }
  0x62   :  { %391 = vmatpush1.msra.mxu0 %v3032_v17  ;;  %2404 = vmatpush3.msra.mxu1 %v3059_v25 }
  0x63   :  { %392 = vmatprep.subr.mxu0 %v3036_v18  ;;  %2405 = vmatprep.subr.mxu1 %v3775_v0 }
  0x64   :  { %393 = vmatpush1.msra.mxu0 %v3042_v20  ;;  %2406 = vmatpush3.msra.mxu1 %v3069_v28 }
  0x65   :  { %394 = vmatprep.subr.mxu0 %v3046_v21  ;;  %2407 = vmatprep.subr.mxu1 %v3775_v0 }
  0x66   :  { %395 = vmatpush1.msra.mxu0 %v3052_v23  ;;  %2408 = vmatpush3.msra.mxu1 %v3079_v31 }
  0x67   :  { %396 = vmatprep.subr.mxu0 %v3056_v24  ;;  %2409 = vmatprep.subr.mxu1 %v3775_v0 }
  0x68   :  { %397 = vmatpush1.msra.mxu0 %v3062_v26  ;;  %2410 = vmatpush3.msra.mxu1 %v3089_v34 }
  0x69   :  { %398 = vmatprep.subr.mxu0 %v3066_v27  ;;  %2411 = vmatprep.subr.mxu1 %v3775_v0 }
  0x6a   :  { %399 = vmatpush1.msra.mxu0 %v3072_v29  ;;  %2412 = vmatpush3.msra.mxu1 %v3097_v37 }
  0x6b   :  { %400 = vmatprep.subr.mxu0 %v3076_v30  ;;  %2413 = vmatprep.subr.mxu1 %v3775_v0 }
  0x6c   :  { %401 = vmatpush1.msra.mxu0 %v3082_v32  ;;  %2427 = vmatprep.mubr.msk.f32.mxu1 %vm2871_vm0, %v3775_v0 }
  0x6d   :  { %402 = vmatprep.subr.mxu0 %v3086_v33  ;;  %2414 = vmatpush3.msra.mxu1 %v3103_v38 }
  0x6e   :  { %403 = vmatpush1.msra.mxu0 %v3092_v35  ;;  %2415 = vmatprep.subr.mxu1 %v3775_v0 }
  0x6f   :  { %437 = vmatmul.mubr.f32.vlgmr.msra.gmra.mxu0 %v323_v36  ;;  %605 = vmatprep.subr.mxu0 %v2962_v53 }
  0x70   :  { %606 = vmatpush1.msra.mxu0 %v2964_v54  ;;  %2416 = vmatpush3.msra.mxu1 %v3107_v39 }
  0x71   :  { %607 = vmatprep.subr.mxu0 %v2967_v55  ;;  %2417 = vmatprep.subr.mxu1 %v3775_v0 }
  0x72   :  { %608 = vmatpush1.msra.mxu0 %v2971_v57  ;;  %2418 = vmatpush3.msra.mxu1 %v3114_v40 }
  0x73   :  { %609 = vmatprep.subr.mxu0 %v2974_v58  ;;  %2419 = vmatprep.subr.mxu1 %v3775_v0 }
  0x74   :  { %610 = vmatpush1.msra.mxu0 %v2978_v60  ;;  %2420 = vmatpush3.msra.mxu1 %v3120_v41 }
  0x75   :  { %611 = vmatprep.subr.mxu0 %v2981_v61  ;;  %2421 = vmatprep.subr.mxu1 %v3775_v0 }
  0x76   :  { %612 = vmatpush1.msra.mxu0 %v2985_v63  ;;  %2422 = vmatpush3.msra.mxu1 %v3126_v42 }
  0x77   :  { %613 = vmatprep.subr.mxu0 %v2988_v1  ;;  %2423 = vmatprep.subr.mxu1 %v3775_v0 }
  0x78   :  { %614 = vmatpush1.msra.mxu0 %v2992_v3  ;;  %2424 = vmatpush3.msra.mxu1 %v3132_v43 }
  0x79   :  { %615 = vmatprep.subr.mxu0 %v2995_v4  ;;  %2425 = vmatprep.subr.mxu1 %v3775_v0 }
  0x7a   :  { %616 = vmatpush1.msra.mxu0 %v2999_v6  ;;  %2426 = vmatpush3.msra.mxu1 %v3138_v44 }
  0x7b   :  { %617 = vmatprep.subr.mxu0 %v3002_v7  ;;  %2428 = vmatmul.mubr.f32.vlgmr.msra.gmra.mxu1 %v323_v36  ;;  %v3213_v36 = vrot.slane %v2190_v52, %v171_v2 }
  0x7c   :  { %2430 = vmatprep.subr.mxu1 %v3775_v0  ;;  %618 = vmatpush1.msra.mxu0 %v3006_v9 }
  0x7d   :  { %2431 = vmatpush3.msra.mxu1 %v3019_v13  ;;  %619 = vmatprep.subr.mxu0 %v3009_v10 }
  0x7e   :  { %2432 = vmatprep.subr.mxu1 %v3775_v0  ;;  %620 = vmatpush1.msra.mxu0 %v3013_v11 }
  0x7f   :  { %2433 = vmatpush3.msra.mxu1 %v3029_v16  ;;  %621 = vmatprep.subr.mxu0 %v3016_v12 }
  0x80   :  { %2434 = vmatprep.subr.mxu1 %v3775_v0  ;;  %622 = vmatpush1.msra.mxu0 %v3022_v14 }
  0x81   :  { %2435 = vmatpush3.msra.mxu1 %v3039_v19  ;;  %623 = vmatprep.subr.mxu0 %v3026_v15 }
  0x82   :  { %2436 = vmatprep.subr.mxu1 %v3775_v0  ;;  %624 = vmatpush1.msra.mxu0 %v3032_v17 }
  0x83   :  { %2437 = vmatpush3.msra.mxu1 %v3049_v22  ;;  %625 = vmatprep.subr.mxu0 %v3036_v18 }
  0x84   :  { %2438 = vmatprep.subr.mxu1 %v3775_v0  ;;  %626 = vmatpush1.msra.mxu0 %v3042_v20 }
  0x85   :  { %2439 = vmatpush3.msra.mxu1 %v3059_v25  ;;  %627 = vmatprep.subr.mxu0 %v3046_v21 }
  0x86   :  { %2440 = vmatprep.subr.mxu1 %v3775_v0  ;;  %628 = vmatpush1.msra.mxu0 %v3052_v23 }
  0x87   :  { %2441 = vmatpush3.msra.mxu1 %v3069_v28  ;;  %629 = vmatprep.subr.mxu0 %v3056_v24 }
  0x88   :  { %2442 = vmatprep.subr.mxu1 %v3775_v0  ;;  %630 = vmatpush1.msra.mxu0 %v3062_v26 }
  0x89   :  { %2443 = vmatpush3.msra.mxu1 %v3079_v31  ;;  %631 = vmatprep.subr.mxu0 %v3066_v27 }
  0x8a   :  { %2444 = vmatprep.subr.mxu1 %v3775_v0  ;;  %632 = vmatpush1.msra.mxu0 %v3072_v29 }
  0x8b   :  { %2445 = vmatpush3.msra.mxu1 %v3089_v34  ;;  %633 = vmatprep.subr.mxu0 %v3076_v30 }
  0x8c   :  { %2446 = vmatprep.subr.mxu1 %v3775_v0  ;;  %634 = vmatpush1.msra.mxu0 %v3082_v32 }
  0x8d   :  { %2447 = vmatpush3.msra.mxu1 %v3097_v37  ;;  %635 = vmatprep.subr.mxu0 %v3086_v33 }
  0x8e   :  { %2448 = vmatprep.subr.mxu1 %v3775_v0  ;;  %636 = vmatpush1.msra.mxu0 %v3092_v35 }
  0x8f   :  { %2449 = vmatpush3.msra.mxu1 %v3103_v38  ;;  %669 = vmatprep.mubr.f32.mxu0 %v3775_v0 }
  0x90   :  { %2450 = vmatprep.subr.mxu1 %v3775_v0  ;;  %2462 = vmatprep.mubr.msk.f32.mxu1 %vm2871_vm0, %v3775_v0 }
  0x91   :  { %2451 = vmatpush3.msra.mxu1 %v3107_v39  ;;  %834 = vmatprep.subr.mxu0 %v2962_v53 }
  0x92   :  { %2452 = vmatprep.subr.mxu1 %v3775_v0 }
  0x93   :  { %2453 = vmatpush3.msra.mxu1 %v3114_v40 }
  0x94   :  { %2454 = vmatprep.subr.mxu1 %v3775_v0 }
  0x95   :  { %2455 = vmatpush3.msra.mxu1 %v3120_v41 }
  0x96   :  { %2456 = vmatprep.subr.mxu1 %v3775_v0 }
  0x97   :  { %2457 = vmatpush3.msra.mxu1 %v3126_v42 }
  0x98   :  { %2458 = vmatprep.subr.mxu1 %v3775_v0 }
  0x99   :  { %2459 = vmatpush3.msra.mxu1 %v3132_v43 }
  0x9a   :  { %2460 = vmatprep.subr.mxu1 %v3775_v0 }
  0x9b   :  { %2461 = vmatpush3.msra.mxu1 %v3138_v44 }
  0x9c   :  { %2465 = vmatprep.subr.mxu1 %v3775_v0  ;;  %v172_v0 = vrot.slane %v163_v50, %v171_v2 }
 0x10f   :  { %v246_v51 = vpop.f32.mrf.mxu0 }
 0x110   :  { %v3211_v8 = vadd.f32 %v246_v51, %v168_v56 }
 0x111   :  { %v248_v62 = vpop.f32.mrf.mxu0 }
 0x112   :  { %v3218_v33 = vadd.f32 %v248_v62, %v172_v0 }
 0x119   :  { %v317_v45 = vpop.f32.mrf.mxu1 }
 0x11b   :  { %v2394_v47 = vpop.f32.mrf.mxu1 }
 0x12f   :  { %v438_v5 = vpop.f32.mrf.mxu0 }
 0x130   :  { %v529_v46 = vadd.f32 %v3209_v59, %v438_v5  ;;  %v175_v5 = vsub.s32 2, %v166_v48 }
 0x131   :  { %v440_v47 = vpop.f32.mrf.mxu0 }
 0x132   :  { %v532_v53 = vadd.f32 %v529_v46, %v3211_v8  ;;  %v530_v35 = vadd.f32 %v3213_v36, %v440_v47  ;;  %v3221_v59 = vrot.slane %v2190_v52, %v175_v5  ;;  %v176_v46 = vrot.slane %v163_v50, %v175_v5  ;;  %v3817_v5 = vld [vmem:[#allocation19_spill] sm:$0xff] }
 0x134   :  { %v2191_v44 = vmul.f32 -1.442695, %v532_v53  ;;  %v539_v49 = vadd.f32 %v530_v35, %v3218_v33  ;;  %v3224_v62 = vadd.f32 %v317_v45, %v176_v46  ;;  %v3816_v45 = vld [vmem:[#allocation18_spill] sm:$0xff]  ;;  %v3819_v46 = vld [vmem:[#allocation20_spill] sm:$0xff] }
 0x136   :  { %2686 = vpow2.f32 %v2191_v44  ;;  %v2192_v43 = vmul.f32 -1.442695, %v539_v49  ;;  %v551_v49 = vld [vmem:[#allocation3] sm:$0x1] }
 0x138   :  { %2688 = vpow2.f32 %v2192_v43 }
 0x13b   :  { %v509_v32 = vpop.f32.mrf.mxu1 }
 0x13c   :  { %v531_v47 = vadd.f32 %v3221_v59, %v509_v32  ;;  %v3815_v32 = vmov 0.0  }
 0x13d   :  { %v2429_v51 = vpop.f32.mrf.mxu1 }
 0x143   :  { %v2687_v56 = vpop.eup %2686 }
 0x144   :  { %v536_v30 = vadd.f32 1.0, %v2687_v56 }
 0x145   :  { %v2689_v2 = vpop.eup %2688 }
 0x146   :  { %2690 = vrcp.f32 %v536_v30  ;;  %v543_v53 = vadd.f32 1.0, %v2689_v2  ;;  %v3818_v2 = vld [vmem:[#allocation22_spill] sm:$0xff] }
 0x148   :  { %2692 = vrcp.f32 %v543_v53  ;;  %v3820_v53 = vld [vmem:[#allocation21_spill] sm:$0xff] }
 0x153   :  { %v2691_v0 = vpop.eup %2690 }
 0x154   :  { %v546_v35 = vmul.f32 %v2691_v0, %v531_v47  ;;  %v3821_v47 = vld [vmem:[#allocation23_spill] sm:$0xff]  ;;  %v3822_v0 = vld [vmem:[#allocation17_spill] sm:$0xff] }
 0x155   :  { %v2693_v43 = vpop.eup %2692 }
 0x156   :  { %v547_v44 = vadd.f32 %v546_v35, %v3224_v62  ;;  %v549_v51 = vsub.f32 1.0, %v2693_v43  ;;  %v552_v48 = vmul.f32 %v2693_v43, %v551_v49  ;;  %v3823_v43 = vld [vmem:[#allocation24_spill] sm:$0xff] }
 0x158   :  { %2694 = vtanh.f32 %v547_v44 }
 0x165   :  { %v2695_v30 = vpop.eup %2694 }
 0x166   :  { %v550_v52 = vmul.f32 %v2695_v30, %v549_v51 }
 0x168   :  { %v553_v56 = vadd.f32 %v552_v48, %v550_v52 }
 0x16a   :  { %554 = vst [vmem:[#allocation12] sm:$0x1] %v553_v56  ;;  %555 = vst [vmem:[#allocation3] sm:$0x1] %v553_v56 }
 0x171   :  { %v556_v50 = vld [vmem:[#allocation3] sm:$0xff] }
 0x172   :  { %670 = vmatmul.mubr.f32.vlgmr.msra.gmra.mxu0 %v556_v50  ;;  %2463 = vmatmul.mubr.f32.vlgmr.msra.gmra.mxu1 %v556_v50 }
 0x173   :  { %835 = vmatpush1.msra.mxu0 %v2964_v54  ;;  %2466 = vmatpush3.msra.mxu1 %v3019_v13 }
 0x174   :  { %836 = vmatprep.subr.mxu0 %v2967_v55  ;;  %2467 = vmatprep.subr.mxu1 %v3815_v32 }
 0x175   :  { %837 = vmatpush1.msra.mxu0 %v2971_v57  ;;  %2468 = vmatpush3.msra.mxu1 %v3029_v16 }
 0x176   :  { %838 = vmatprep.subr.mxu0 %v2974_v58  ;;  %2469 = vmatprep.subr.mxu1 %v3815_v32 }
 0x177   :  { %839 = vmatpush1.msra.mxu0 %v2978_v60  ;;  %2470 = vmatpush3.msra.mxu1 %v3039_v19 }
 0x178   :  { %840 = vmatprep.subr.mxu0 %v2981_v61  ;;  %2471 = vmatprep.subr.mxu1 %v3815_v32 }
 0x179   :  { %841 = vmatpush1.msra.mxu0 %v2985_v63  ;;  %2472 = vmatpush3.msra.mxu1 %v3049_v22 }
 0x17a   :  { %842 = vmatprep.subr.mxu0 %v2988_v1  ;;  %2473 = vmatprep.subr.mxu1 %v3815_v32 }
 0x17b   :  { %843 = vmatpush1.msra.mxu0 %v2992_v3  ;;  %2474 = vmatpush3.msra.mxu1 %v3059_v25 }
 0x17c   :  { %844 = vmatprep.subr.mxu0 %v2995_v4  ;;  %2475 = vmatprep.subr.mxu1 %v3815_v32 }
 0x17d   :  { %845 = vmatpush1.msra.mxu0 %v2999_v6  ;;  %2476 = vmatpush3.msra.mxu1 %v3069_v28 }
 0x17e   :  { %846 = vmatprep.subr.mxu0 %v3002_v7  ;;  %2477 = vmatprep.subr.mxu1 %v3815_v32 }
 0x17f   :  { %847 = vmatpush1.msra.mxu0 %v3006_v9  ;;  %2478 = vmatpush3.msra.mxu1 %v3079_v31 }
 0x180   :  { %848 = vmatprep.subr.mxu0 %v3009_v10  ;;  %2479 = vmatprep.subr.mxu1 %v3815_v32 }
 0x181   :  { %849 = vmatpush1.msra.mxu0 %v3013_v11  ;;  %2480 = vmatpush3.msra.mxu1 %v3089_v34 }
 0x182   :  { %850 = vmatprep.subr.mxu0 %v3016_v12  ;;  %2481 = vmatprep.subr.mxu1 %v3815_v32 }
 0x183   :  { %851 = vmatpush1.msra.mxu0 %v3022_v14  ;;  %2482 = vmatpush3.msra.mxu1 %v3097_v37 }
 0x184   :  { %852 = vmatprep.subr.mxu0 %v3026_v15  ;;  %2483 = vmatprep.subr.mxu1 %v3815_v32 }
 0x185   :  { %853 = vmatpush1.msra.mxu0 %v3032_v17  ;;  %2484 = vmatpush3.msra.mxu1 %v3103_v38 }
 0x186   :  { %854 = vmatprep.subr.mxu0 %v3036_v18  ;;  %2485 = vmatprep.subr.mxu1 %v3815_v32 }
 0x187   :  { %855 = vmatpush1.msra.mxu0 %v3042_v20  ;;  %2486 = vmatpush3.msra.mxu1 %v3107_v39 }
 0x188   :  { %856 = vmatprep.subr.mxu0 %v3046_v21  ;;  %2487 = vmatprep.subr.mxu1 %v3815_v32 }
 0x189   :  { %857 = vmatpush1.msra.mxu0 %v3052_v23  ;;  %2488 = vmatpush3.msra.mxu1 %v3114_v40 }
 0x18a   :  { %858 = vmatprep.subr.mxu0 %v3056_v24  ;;  %2489 = vmatprep.subr.mxu1 %v3815_v32 }
 0x18b   :  { %859 = vmatpush1.msra.mxu0 %v3062_v26  ;;  %2490 = vmatpush3.msra.mxu1 %v3120_v41 }
 0x18c   :  { %860 = vmatprep.subr.mxu0 %v3066_v27  ;;  %2491 = vmatprep.subr.mxu1 %v3815_v32 }
 0x18d   :  { %861 = vmatpush1.msra.mxu0 %v3072_v29  ;;  %2492 = vmatpush3.msra.mxu1 %v3126_v42 }
 0x18e   :  { %862 = vmatprep.subr.mxu0 %v3816_v45  ;;  %2493 = vmatprep.subr.mxu1 %v3815_v32 }
 0x18f   :  { %863 = vmatpush1.msra.mxu0 %v3817_v5  ;;  %2494 = vmatpush3.msra.mxu1 %v3818_v2 }
 0x190   :  { %864 = vmatprep.subr.mxu0 %v3819_v46  ;;  %2495 = vmatprep.subr.mxu1 %v3815_v32 }
 0x191   :  { %865 = vmatpush1.msra.mxu0 %v3820_v53  ;;  %898 = vmatprep.mubr.f32.mxu0 %v3815_v32 }
 0x192   :  { %2496 = vmatpush3.msra.mxu1 %v3821_v47  ;;  %2497 = vmatprep.mubr.msk.f32.mxu1 %vm2871_vm0, %v3815_v32 }
 0x193   :  { %1063 = vmatprep.subr.mxu0 %v3822_v0  ;;  %2500 = vmatprep.subr.mxu1 %v3815_v32 }
 0x232   :  { %v671_v35 = vpop.f32.mrf.mxu0  ;;  %v742_v44 = vpop.f32.mrf.mxu1 }
 0x233   :  { %v746_v49 = vadd.f32 %v671_v35, %v3823_v43  ;;  %v748_v35 = vadd.f32 %v742_v44, %v3221_v59  ;;  %v3394_v44 = vld [vmem:[#allocation11 + $0x140] sm:$0xff] }
 0x234   :  { %v673_v51 = vpop.f32.mrf.mxu0  ;;  %v2464_v30 = vpop.f32.mrf.mxu1 }
 0x235   :  { %v750_v48 = vrot.slane %v746_v49, 7  ;;  %v747_v52 = vadd.f32 %v673_v51, %v3213_v36  ;;  %v770_v30 = vrot.slane %v748_v35, 7  ;;  %v3400_v35 = vld [vmem:[#allocation11 + $0x148] sm:$0xff] }
 0x237   :  { %v752_v56 = vadd.f32 %v750_v48, %v3211_v8  ;;  %v760_v47 = vrot.slane %v747_v52, 7  ;;  %v777_v52 = vld [vmem:[#allocation3] sm:$0x1] }
 0x239   :  { %v2193_v50 = vmul.f32 -1.442695, %v752_v56  ;;  %v762_v53 = vadd.f32 %v760_v47, %v3218_v33  ;;  %v779_v47 = vrot.slane %v777_v52, 7  ;;  %v3418_v52 = vld [vmem:[#allocation11 + $0x108] sm:$0xff] }
 0x23b   :  { %2696 = vpow2.f32 %v2193_v50  ;;  %v2194_v46 = vmul.f32 -1.442695, %v762_v53 }
 0x23d   :  { %2698 = vpow2.f32 %v2194_v46 }
 0x248   :  { %v2697_v0 = vpop.eup %2696 }
 0x249   :  { %v756_v2 = vadd.f32 1.0, %v2697_v0 }
 0x24a   :  { %v2699_v5 = vpop.eup %2698 }
 0x24b   :  { %2700 = vrcp.f32 %v756_v2  ;;  %v766_v43 = vadd.f32 1.0, %v2699_v5  ;;  %v3390_v5 = vld [vmem:[#allocation11 + $0x160] sm:$0xff] }
 0x24d   :  { %2702 = vrcp.f32 %v766_v43  ;;  %v3398_v43 = vld [vmem:[#allocation11 + $0x138] sm:$0xff] }
 0x258   :  { %v2701_v49 = vpop.eup %2700 }
 0x259   :  { %v772_v45 = vmul.f32 %v2701_v49, %v770_v30  ;;  %v3404_v30 = vld [vmem:[#allocation11 + $0x128] sm:$0xff]  ;;  %v3408_v49 = vld [vmem:[#allocation11 + $0x120] sm:$0xff] }
 0x25a   :  { %v2703_v48 = vpop.eup %2702 }
 0x25b   :  { %v773_v51 = vadd.f32 %v772_v45, %v3224_v62  ;;  %v775_v56 = vsub.f32 1.0, %v2703_v48  ;;  %v781_v50 = vmul.f32 %v2703_v48, %v779_v47  ;;  %v3388_v45 = vld [vmem:[#allocation11 + $0x150] sm:$0xff]  ;;  %v3424_v47 = vld [vmem:[#allocation11 + $0xf8] sm:$0xff] }
 0x25c   :  { %v3414_v48 = vld [vmem:[#allocation11 + $0x110] sm:$0xff] }
 0x25d   :  { %2704 = vtanh.f32 %v773_v51  ;;  %v3410_v51 = vld [vmem:[#allocation11 + $0x130] sm:$0xff] }
 0x26a   :  { %v2705_v53 = vpop.eup %2704 }
 0x26b   :  { %v776_v46 = vmul.f32 %v2705_v53, %v775_v56  ;;  %v3420_v56 = vld [vmem:[#allocation11 + $0x118] sm:$0xff]  ;;  %v3428_v53 = vld [vmem:[#allocation11 + $0xf0] sm:$0xff] }
 0x26d   :  { %v782_v0 = vadd.f32 %v781_v50, %v776_v46  ;;  %v3430_v46 = vld [vmem:[#allocation11 + $0x100] sm:$0xff] }
 0x26e   :  { %v3434_v50 = vld [vmem:[#allocation11 + $0xe0] sm:$0xff] }
 0x26f   :  { %783 = vst [vmem:[#allocation12] sm:$0x2] %v782_v0  ;;  %784 = vst [vmem:[#allocation3 - $0x1] sm:$0x2] %v782_v0  ;;  %v3438_v0 = vld [vmem:[#allocation11 + $0xd8] sm:$0xff] }
 0x276   :  { %v785_v2 = vld [vmem:[#allocation3] sm:$0xff] }
 0x277   :  { %899 = vmatmul.mubr.f32.vlgmr.msra.gmra.mxu0 %v785_v2  ;;  %2498 = vmatmul.mubr.f32.vlgmr.msra.gmra.mxu1 %v785_v2  ;;  %v3440_v2 = vld [vmem:[#allocation11 + $0xe8] sm:$0xff] }
 0x278   :  { %1064 = vmatpush1.msra.mxu0 %v2964_v54  ;;  %2501 = vmatpush3.msra.mxu1 %v3019_v13  ;;  %v3824_v54 = vld [vmem:[#allocation18_spill] sm:$0xff] }
 0x279   :  { %1065 = vmatprep.subr.mxu0 %v2967_v55  ;;  %2502 = vmatprep.subr.mxu1 %v3815_v32  ;;  %v3825_v55 = vld [vmem:[#allocation19_spill] sm:$0xff] }
 0x27a   :  { %1066 = vmatpush1.msra.mxu0 %v2971_v57  ;;  %2503 = vmatpush3.msra.mxu1 %v3029_v16  ;;  %v3826_v57 = vld [vmem:[#allocation22_spill] sm:$0xff] }
 0x27b   :  { %1067 = vmatprep.subr.mxu0 %v2974_v58  ;;  %2504 = vmatprep.subr.mxu1 %v3815_v32  ;;  %v3827_v58 = vld [vmem:[#allocation20_spill] sm:$0xff] }
 0x27c   :  { %1068 = vmatpush1.msra.mxu0 %v2978_v60  ;;  %2505 = vmatpush3.msra.mxu1 %v3039_v19  ;;  %v3828_v60 = vld [vmem:[#allocation21_spill] sm:$0xff] }
 0x27d   :  { %1069 = vmatprep.subr.mxu0 %v2981_v61  ;;  %2506 = vmatprep.subr.mxu1 %v3815_v32  ;;  %v3829_v61 = vld [vmem:[#allocation23_spill] sm:$0xff] }
 0x27e   :  { %1070 = vmatpush1.msra.mxu0 %v2985_v63  ;;  %2507 = vmatpush3.msra.mxu1 %v3049_v22 }
 0x27f   :  { %1071 = vmatprep.subr.mxu0 %v2988_v1  ;;  %2508 = vmatprep.subr.mxu1 %v3815_v32 }
 0x280   :  { %1072 = vmatpush1.msra.mxu0 %v2992_v3  ;;  %2509 = vmatpush3.msra.mxu1 %v3059_v25  ;;  %v3830_v3 = vld [vmem:[#allocation24_spill] sm:$0xff] }
 0x281   :  { %1073 = vmatprep.subr.mxu0 %v2995_v4  ;;  %2510 = vmatprep.subr.mxu1 %v3815_v32 }
 0x282   :  { %1074 = vmatpush1.msra.mxu0 %v2999_v6  ;;  %2511 = vmatpush3.msra.mxu1 %v3069_v28 }
 0x283   :  { %1075 = vmatprep.subr.mxu0 %v3002_v7  ;;  %2512 = vmatprep.subr.mxu1 %v3815_v32 }
 0x284   :  { %1076 = vmatpush1.msra.mxu0 %v3006_v9  ;;  %2513 = vmatpush3.msra.mxu1 %v3079_v31 }
 0x285   :  { %1077 = vmatprep.subr.mxu0 %v3009_v10  ;;  %2514 = vmatprep.subr.mxu1 %v3815_v32 }
 0x286   :  { %1078 = vmatpush1.msra.mxu0 %v3013_v11  ;;  %2515 = vmatpush3.msra.mxu1 %v3089_v34 }
 0x287   :  { %1079 = vmatprep.subr.mxu0 %v3016_v12  ;;  %2516 = vmatprep.subr.mxu1 %v3815_v32 }
 0x288   :  { %1080 = vmatpush1.msra.mxu0 %v3022_v14  ;;  %2517 = vmatpush3.msra.mxu1 %v3097_v37 }
 0x289   :  { %1081 = vmatprep.subr.mxu0 %v3026_v15  ;;  %2518 = vmatprep.subr.mxu1 %v3815_v32 }
 0x28a   :  { %1082 = vmatpush1.msra.mxu0 %v3032_v17  ;;  %2519 = vmatpush3.msra.mxu1 %v3103_v38 }
 0x28b   :  { %1083 = vmatprep.subr.mxu0 %v3036_v18  ;;  %2520 = vmatprep.subr.mxu1 %v3815_v32 }
 0x28c   :  { %1084 = vmatpush1.msra.mxu0 %v3042_v20  ;;  %2521 = vmatpush3.msra.mxu1 %v3107_v39  ;;  %v3375_v39 = vld [vmem:[#allocation11 + $0x170] sm:$0xff] }
 0x28d   :  { %1085 = vmatprep.subr.mxu0 %v3046_v21  ;;  %2522 = vmatprep.subr.mxu1 %v3815_v32  ;;  %3831 = vst [vmem:[#allocation17_spill] sm:$0xff] %v3375_v39 }
 0x28e   :  { %1086 = vmatpush1.msra.mxu0 %v3052_v23  ;;  %2523 = vmatpush3.msra.mxu1 %v3114_v40  ;;  %v3378_v40 = vld [vmem:[#allocation11 + $0x168] sm:$0xff] }
 0x28f   :  { %1087 = vmatprep.subr.mxu0 %v3056_v24  ;;  %2524 = vmatprep.subr.mxu1 %v3815_v32 }
 0x290   :  { %1088 = vmatpush1.msra.mxu0 %v3062_v26  ;;  %2525 = vmatpush3.msra.mxu1 %v3120_v41  ;;  %v1006_v26 = vld [vmem:[#allocation3] sm:$0x1]  ;;  %v3380_v41 = vld [vmem:[#allocation11 + $0x178] sm:$0xff] }
 0x291   :  { %1089 = vmatprep.subr.mxu0 %v3066_v27  ;;  %2526 = vmatprep.subr.mxu1 %v3815_v32  ;;  %v1008_v28 = vrot.slane %v1006_v26, 6 }
 0x292   :  { %1090 = vmatpush1.msra.mxu0 %v3072_v29  ;;  %2527 = vmatpush3.msra.mxu1 %v3126_v42  ;;  %v3384_v42 = vld [vmem:[#allocation11 + $0x158] sm:$0xff] }
 0x293   :  { %1091 = vmatprep.subr.mxu0 %v3824_v54  ;;  %2528 = vmatprep.subr.mxu1 %v3815_v32  ;;  %v3444_v54 = vld [vmem:[#allocation11 + $0xc8] sm:$0xff] }
 0x294   :  { %1092 = vmatpush1.msra.mxu0 %v3825_v55  ;;  %2529 = vmatpush3.msra.mxu1 %v3826_v57  ;;  %v3448_v55 = vld [vmem:[#allocation11 + $0xc0] sm:$0xff]  ;;  %v3450_v57 = vld [vmem:[#allocation11 + $0xd0] sm:$0xff] }
 0x295   :  { %1093 = vmatprep.subr.mxu0 %v3827_v58  ;;  %2530 = vmatprep.subr.mxu1 %v3815_v32  ;;  %v3454_v58 = vld [vmem:[#allocation11 + $0xb0] sm:$0xff] }
 0x296   :  { %1094 = vmatpush1.msra.mxu0 %v3828_v60  ;;  %1127 = vmatprep.mubr.f32.mxu0 %v3815_v32  ;;  %v3458_v60 = vld [vmem:[#allocation11 + $0xa8] sm:$0xff] }
 0x297   :  { %2531 = vmatpush3.msra.mxu1 %v3829_v61  ;;  %2532 = vmatprep.mubr.msk.f32.mxu1 %vm2871_vm0, %v3815_v32  ;;  %v3460_v61 = vld [vmem:[#allocation11 + $0xb8] sm:$0xff] }
 0x298   :  { %2535 = vmatprep.subr.mxu1 %v3815_v32  ;;  %1292 = vmatprep.subr.mxu0 %v3375_v39 }
 0x337   :  { %v900_v63 = vpop.f32.mrf.mxu0  ;;  %v971_v1 = vpop.f32.mrf.mxu1 }
 0x338   :  { %v975_v4 = vadd.f32 %v900_v63, %v3830_v3  ;;  %v977_v19 = vadd.f32 %v971_v1, %v3221_v59  ;;  %v3464_v63 = vld [vmem:[#allocation11 + $0x98] sm:$0xff]  ;;  %v3468_v1 = vld [vmem:[#allocation11 + $0x90] sm:$0xff] }
 0x339   :  { %v902_v6 = vpop.f32.mrf.mxu0  ;;  %v2499_v7 = vpop.f32.mrf.mxu1 }
 0x33a   :  { %v979_v9 = vrot.slane %v975_v4, 6  ;;  %v976_v10 = vadd.f32 %v902_v6, %v3213_v36  ;;  %v999_v21 = vrot.slane %v977_v19, 6  ;;  %v3470_v4 = vld [vmem:[#allocation11 + $0xa0] sm:$0xff]  ;;  %v3478_v7 = vld [vmem:[#allocation11 + $0x78] sm:$0xff] }
 0x33b   :  { %v3474_v6 = vld [vmem:[#allocation11 + $0x80] sm:$0xff] }
 0x33c   :  { %v981_v11 = vadd.f32 %v979_v9, %v3211_v8  ;;  %v989_v13 = vrot.slane %v976_v10, 6  ;;  %v3480_v9 = vld [vmem:[#allocation11 + $0x88] sm:$0xff]  ;;  %v3510_v19 = vld [vmem:[#allocation11 + $0x20] sm:$0xff] }
 0x33d   :  { %v3484_v10 = vld [vmem:[#allocation11 + $0x68] sm:$0xff]  ;;  %3832 = vst [vmem:[#allocation18_spill] sm:$0xff] %v3510_v19 }
 0x33e   :  { %v2195_v12 = vmul.f32 -1.442695, %v981_v11  ;;  %v991_v14 = vadd.f32 %v989_v13, %v3218_v33  ;;  %v3488_v11 = vld [vmem:[#allocation11 + $0x60] sm:$0xff]  ;;  %v3494_v13 = vld [vmem:[#allocation11 + $0x50] sm:$0xff] }
 0x340   :  { %2706 = vpow2.f32 %v2195_v12  ;;  %v2196_v15 = vmul.f32 -1.442695, %v991_v14  ;;  %v3490_v12 = vld [vmem:[#allocation11 + $0x70] sm:$0xff]  ;;  %v3498_v14 = vld [vmem:[#allocation11 + $0x48] sm:$0xff] }
 0x342   :  { %2708 = vpow2.f32 %v2196_v15  ;;  %v3500_v15 = vld [vmem:[#allocation11 + $0x58] sm:$0xff] }
 0x34d   :  { %v2707_v16 = vpop.eup %2706 }
 0x34e   :  { %v985_v17 = vadd.f32 1.0, %v2707_v16  ;;  %v3502_v16 = vld [vmem:[#allocation11 + $0x38] sm:$0xff] }
 0x34f   :  { %v2709_v18 = vpop.eup %2708 }
 0x350   :  { %2710 = vrcp.f32 %v985_v17  ;;  %v995_v20 = vadd.f32 1.0, %v2709_v18  ;;  %v3506_v17 = vld [vmem:[#allocation11 + $0x30] sm:$0xff]  ;;  %v3508_v18 = vld [vmem:[#allocation11 + $0x40] sm:$0xff] }
 0x352   :  { %2712 = vrcp.f32 %v995_v20  ;;  %v3514_v20 = vld [vmem:[#allocation11 + $0x18] sm:$0xff] }
 0x353   :  { %3833 = vst [vmem:[#allocation19_spill] sm:$0xff] %v3514_v20 }
 0x35d   :  { %v2711_v22 = vpop.eup %2710 }
 0x35e   :  { %v1001_v23 = vmul.f32 %v2711_v22, %v999_v21  ;;  %v3516_v21 = vld [vmem:[#allocation11 + $0x28] sm:$0xff] }
 0x35f   :  { %v2713_v25 = vpop.eup %2712  ;;  %3834 = vst [vmem:[#allocation22_spill] sm:$0xff] %v3516_v21  ;;  %v3520_v22 = vld [vmem:[#allocation11 + $0x8] sm:$0xff] }
 0x360   :  { %v1002_v24 = vadd.f32 %v1001_v23, %v3224_v62  ;;  %v1004_v27 = vsub.f32 1.0, %v2713_v25  ;;  %v1010_v34 = vmul.f32 %v2713_v25, %v1008_v28  ;;  %3835 = vst [vmem:[#allocation20_spill] sm:$0xff] %v3520_v22  ;;  %v3524_v23 = vld [vmem:[#allocation11] sm:$0xff] }
 0x361   :  { %3836 = vst [vmem:[#allocation21_spill] sm:$0xff] %v3524_v23 }
 0x362   :  { %2714 = vtanh.f32 %v1002_v24  ;;  %v3526_v24 = vld [vmem:[#allocation11 + $0x10] sm:$0xff] }
 0x363   :  { %3837 = vst [vmem:[#allocation23_spill] sm:$0xff] %v3526_v24 }
 0x36f   :  { %v2715_v29 = vpop.eup %2714 }
 0x370   :  { %v1005_v31 = vmul.f32 %v2715_v29, %v1004_v27 }
 0x372   :  { %v1011_v37 = vadd.f32 %v1010_v34, %v1005_v31 }
 0x374   :  { %1012 = vst [vmem:[#allocation12] sm:$0x4] %v1011_v37  ;;  %1013 = vst [vmem:[#allocation3 - $0x2] sm:$0x4] %v1011_v37 }
 0x37b   :  { %v1014_v38 = vld [vmem:[#allocation3] sm:$0xff] }
 0x37c   :  { %1128 = vmatmul.mubr.f32.vlgmr.msra.gmra.mxu0 %v1014_v38  ;;  %2533 = vmatmul.mubr.f32.vlgmr.msra.gmra.mxu1 %v1014_v38 }
 0x37d   :  { %1356 = vmatprep.mubr.f32.mxu0 %v3815_v32  ;;  %2567 = vmatprep.mubr.msk.f32.mxu1 %vm2871_vm0, %v3815_v32 }
 0x37e   :  { %1293 = vmatpush1.msra.mxu0 %v3378_v40  ;;  %2536 = vmatpush3.msra.mxu1 %v3380_v41 }
 0x37f   :  { %1294 = vmatprep.subr.mxu0 %v3384_v42  ;;  %2537 = vmatprep.subr.mxu1 %v3815_v32 }
 0x380   :  { %1295 = vmatpush1.msra.mxu0 %v3388_v45  ;;  %2538 = vmatpush3.msra.mxu1 %v3390_v5 }
 0x381   :  { %1296 = vmatprep.subr.mxu0 %v3394_v44  ;;  %2539 = vmatprep.subr.mxu1 %v3815_v32 }
 0x382   :  { %1297 = vmatpush1.msra.mxu0 %v3398_v43  ;;  %2540 = vmatpush3.msra.mxu1 %v3400_v35 }
 0x383   :  { %1298 = vmatprep.subr.mxu0 %v3404_v30  ;;  %2541 = vmatprep.subr.mxu1 %v3815_v32 }
 0x384   :  { %1299 = vmatpush1.msra.mxu0 %v3408_v49  ;;  %2542 = vmatpush3.msra.mxu1 %v3410_v51 }
 0x385   :  { %1300 = vmatprep.subr.mxu0 %v3414_v48  ;;  %2543 = vmatprep.subr.mxu1 %v3815_v32 }
 0x386   :  { %1301 = vmatpush1.msra.mxu0 %v3418_v52  ;;  %2544 = vmatpush3.msra.mxu1 %v3420_v56 }
 0x387   :  { %1302 = vmatprep.subr.mxu0 %v3424_v47  ;;  %2545 = vmatprep.subr.mxu1 %v3815_v32 }
 0x388   :  { %1303 = vmatpush1.msra.mxu0 %v3428_v53  ;;  %2546 = vmatpush3.msra.mxu1 %v3430_v46 }
 0x389   :  { %1304 = vmatprep.subr.mxu0 %v3434_v50  ;;  %2547 = vmatprep.subr.mxu1 %v3815_v32 }
 0x38a   :  { %1305 = vmatpush1.msra.mxu0 %v3438_v0  ;;  %2548 = vmatpush3.msra.mxu1 %v3440_v2 }
 0x38b   :  { %1306 = vmatprep.subr.mxu0 %v3444_v54  ;;  %2549 = vmatprep.subr.mxu1 %v3815_v32 }
 0x38c   :  { %1307 = vmatpush1.msra.mxu0 %v3448_v55  ;;  %2550 = vmatpush3.msra.mxu1 %v3450_v57 }
 0x38d   :  { %1308 = vmatprep.subr.mxu0 %v3454_v58  ;;  %2551 = vmatprep.subr.mxu1 %v3815_v32 }
 0x38e   :  { %1309 = vmatpush1.msra.mxu0 %v3458_v60  ;;  %2552 = vmatpush3.msra.mxu1 %v3460_v61 }
 0x38f   :  { %1310 = vmatprep.subr.mxu0 %v3464_v63  ;;  %2553 = vmatprep.subr.mxu1 %v3815_v32 }
 0x390   :  { %1311 = vmatpush1.msra.mxu0 %v3468_v1  ;;  %2554 = vmatpush3.msra.mxu1 %v3470_v4 }
 0x391   :  { %1312 = vmatprep.subr.mxu0 %v3474_v6  ;;  %2555 = vmatprep.subr.mxu1 %v3815_v32 }
 0x392   :  { %1313 = vmatpush1.msra.mxu0 %v3478_v7  ;;  %2556 = vmatpush3.msra.mxu1 %v3480_v9 }
 0x393   :  { %1314 = vmatprep.subr.mxu0 %v3484_v10  ;;  %2557 = vmatprep.subr.mxu1 %v3815_v32 }
 0x394   :  { %1315 = vmatpush1.msra.mxu0 %v3488_v11  ;;  %2558 = vmatpush3.msra.mxu1 %v3490_v12 }
 0x395   :  { %1316 = vmatprep.subr.mxu0 %v3494_v13  ;;  %2559 = vmatprep.subr.mxu1 %v3815_v32 }
 0x396   :  { %1317 = vmatpush1.msra.mxu0 %v3498_v14  ;;  %2560 = vmatpush3.msra.mxu1 %v3500_v15 }
 0x397   :  { %1318 = vmatprep.subr.mxu0 %v3502_v16  ;;  %2561 = vmatprep.subr.mxu1 %v3815_v32 }
 0x398   :  { %1319 = vmatpush1.msra.mxu0 %v3506_v17  ;;  %2562 = vmatpush3.msra.mxu1 %v3508_v18 }
 0x399   :  { %1320 = vmatprep.subr.mxu0 %v3510_v19  ;;  %2563 = vmatprep.subr.mxu1 %v3815_v32 }
 0x39a   :  { %1321 = vmatpush1.msra.mxu0 %v3514_v20  ;;  %2564 = vmatpush3.msra.mxu1 %v3516_v21 }
 0x39b   :  { %1322 = vmatprep.subr.mxu0 %v3520_v22  ;;  %2565 = vmatprep.subr.mxu1 %v3815_v32 }
 0x39c   :  { %1323 = vmatpush1.msra.mxu0 %v3524_v23  ;;  %2566 = vmatpush3.msra.mxu1 %v3526_v24 }
 0x39d   :  { %1521 = vmatprep.subr.mxu0 %v3375_v39  ;;  %2570 = vmatprep.subr.mxu1 %v3815_v32 }
 0x43c   :  { %v1129_v25 = vpop.f32.mrf.mxu0  ;;  %v1200_v26 = vpop.f32.mrf.mxu1 }
 0x43d   :  { %v1204_v27 = vadd.f32 %v1129_v25, %v3830_v3  ;;  %v1206_v25 = vadd.f32 %v1200_v26, %v3221_v59  ;;  %v3841_v26 = vld [vmem:[#allocation20_spill] sm:$0xff] }
 0x43e   :  { %v1131_v28 = vpop.f32.mrf.mxu0  ;;  %v2534_v29 = vpop.f32.mrf.mxu1 }
 0x43f   :  { %v1208_v31 = vrot.slane %v1204_v27, 5  ;;  %v1205_v34 = vadd.f32 %v1131_v28, %v3213_v36  ;;  %v1228_v29 = vrot.slane %v1206_v25, 5  ;;  %v3842_v25 = vld [vmem:[#allocation21_spill] sm:$0xff] }
 0x441   :  { %v1210_v37 = vadd.f32 %v1208_v31, %v3211_v8  ;;  %v1218_v22 = vrot.slane %v1205_v34, 5  ;;  %v1235_v34 = vld [vmem:[#allocation3] sm:$0x1] }
 0x443   :  { %v2197_v38 = vmul.f32 -1.442695, %v1210_v37  ;;  %v1220_v24 = vadd.f32 %v1218_v22, %v3218_v33  ;;  %v1237_v22 = vrot.slane %v1235_v34, 5  ;;  %v3845_v34 = vld [vmem:[#allocation24_spill] sm:$0xff] }
 0x445   :  { %2716 = vpow2.f32 %v2197_v38  ;;  %v2198_v23 = vmul.f32 -1.442695, %v1220_v24 }
 0x447   :  { %2718 = vpow2.f32 %v2198_v23 }
 0x452   :  { %v2717_v39 = vpop.eup %2716 }
 0x453   :  { %v1214_v21 = vadd.f32 1.0, %v2717_v39 }
 0x454   :  { %v2719_v20 = vpop.eup %2718 }
 0x455   :  { %2720 = vrcp.f32 %v1214_v21  ;;  %v1224_v3 = vadd.f32 1.0, %v2719_v20  ;;  %v3840_v20 = vld [vmem:[#allocation22_spill] sm:$0xff] }
 0x457   :  { %2722 = vrcp.f32 %v1224_v3  ;;  %v3838_v3 = vld [vmem:[#allocation18_spill] sm:$0xff] }
 0x462   :  { %v2721_v27 = vpop.eup %2720 }
 0x463   :  { %v1230_v19 = vmul.f32 %v2721_v27, %v1228_v29  ;;  %v3843_v29 = vld [vmem:[#allocation23_spill] sm:$0xff]  ;;  %v3844_v27 = vld [vmem:[#allocation17_spill] sm:$0xff] }
 0x464   :  { %v2723_v31 = vpop.eup %2722 }
 0x465   :  { %v1231_v28 = vadd.f32 %v1230_v19, %v3224_v62  ;;  %v1233_v37 = vsub.f32 1.0, %v2723_v31  ;;  %v1239_v38 = vmul.f32 %v2723_v31, %v1237_v22  ;;  %v3839_v19 = vld [vmem:[#allocation19_spill] sm:$0xff] }
 0x467   :  { %2724 = vtanh.f32 %v1231_v28 }
 0x474   :  { %v2725_v24 = vpop.eup %2724 }
 0x475   :  { %v1234_v23 = vmul.f32 %v2725_v24, %v1233_v37 }
 0x477   :  { %v1240_v39 = vadd.f32 %v1239_v38, %v1234_v23 }
 0x479   :  { %1241 = vst [vmem:[#allocation12] sm:$0x8] %v1240_v39  ;;  %1242 = vst [vmem:[#allocation3 - $0x3] sm:$0x8] %v1240_v39 }
 0x480   :  { %v1243_v21 = vld [vmem:[#allocation3] sm:$0xff] }
 0x481   :  { %1357 = vmatmul.mubr.f32.vlgmr.msra.gmra.mxu0 %v1243_v21  ;;  %2568 = vmatmul.mubr.f32.vlgmr.msra.gmra.mxu1 %v1243_v21 }
 0x482   :  { %1522 = vmatpush1.msra.mxu0 %v3378_v40  ;;  %2571 = vmatpush3.msra.mxu1 %v3380_v41 }
 0x483   :  { %1523 = vmatprep.subr.mxu0 %v3384_v42  ;;  %2572 = vmatprep.subr.mxu1 %v3815_v32 }
 0x484   :  { %1524 = vmatpush1.msra.mxu0 %v3388_v45  ;;  %2573 = vmatpush3.msra.mxu1 %v3390_v5 }
 0x485   :  { %1525 = vmatprep.subr.mxu0 %v3394_v44  ;;  %2574 = vmatprep.subr.mxu1 %v3815_v32 }
 0x486   :  { %1526 = vmatpush1.msra.mxu0 %v3398_v43  ;;  %2575 = vmatpush3.msra.mxu1 %v3400_v35 }
 0x487   :  { %1527 = vmatprep.subr.mxu0 %v3404_v30  ;;  %2576 = vmatprep.subr.mxu1 %v3815_v32 }
 0x488   :  { %1528 = vmatpush1.msra.mxu0 %v3408_v49  ;;  %2577 = vmatpush3.msra.mxu1 %v3410_v51 }
 0x489   :  { %1529 = vmatprep.subr.mxu0 %v3414_v48  ;;  %2578 = vmatprep.subr.mxu1 %v3815_v32 }
 0x48a   :  { %1530 = vmatpush1.msra.mxu0 %v3418_v52  ;;  %2579 = vmatpush3.msra.mxu1 %v3420_v56 }
 0x48b   :  { %1531 = vmatprep.subr.mxu0 %v3424_v47  ;;  %2580 = vmatprep.subr.mxu1 %v3815_v32 }
 0x48c   :  { %1532 = vmatpush1.msra.mxu0 %v3428_v53  ;;  %2581 = vmatpush3.msra.mxu1 %v3430_v46 }
 0x48d   :  { %1533 = vmatprep.subr.mxu0 %v3434_v50  ;;  %2582 = vmatprep.subr.mxu1 %v3815_v32 }
 0x48e   :  { %1534 = vmatpush1.msra.mxu0 %v3438_v0  ;;  %2583 = vmatpush3.msra.mxu1 %v3440_v2 }
 0x48f   :  { %1535 = vmatprep.subr.mxu0 %v3444_v54  ;;  %2584 = vmatprep.subr.mxu1 %v3815_v32 }
 0x490   :  { %1536 = vmatpush1.msra.mxu0 %v3448_v55  ;;  %2585 = vmatpush3.msra.mxu1 %v3450_v57 }
 0x491   :  { %1537 = vmatprep.subr.mxu0 %v3454_v58  ;;  %2586 = vmatprep.subr.mxu1 %v3815_v32 }
 0x492   :  { %1538 = vmatpush1.msra.mxu0 %v3458_v60  ;;  %2587 = vmatpush3.msra.mxu1 %v3460_v61 }
 0x493   :  { %1539 = vmatprep.subr.mxu0 %v3464_v63  ;;  %2588 = vmatprep.subr.mxu1 %v3815_v32 }
 0x494   :  { %1540 = vmatpush1.msra.mxu0 %v3468_v1  ;;  %2589 = vmatpush3.msra.mxu1 %v3470_v4 }
 0x495   :  { %1541 = vmatprep.subr.mxu0 %v3474_v6  ;;  %2590 = vmatprep.subr.mxu1 %v3815_v32 }
 0x496   :  { %1542 = vmatpush1.msra.mxu0 %v3478_v7  ;;  %2591 = vmatpush3.msra.mxu1 %v3480_v9 }
 0x497   :  { %1543 = vmatprep.subr.mxu0 %v3484_v10  ;;  %2592 = vmatprep.subr.mxu1 %v3815_v32 }
 0x498   :  { %1544 = vmatpush1.msra.mxu0 %v3488_v11  ;;  %2593 = vmatpush3.msra.mxu1 %v3490_v12 }
 0x499   :  { %1545 = vmatprep.subr.mxu0 %v3494_v13  ;;  %2594 = vmatprep.subr.mxu1 %v3815_v32 }
 0x49a   :  { %1546 = vmatpush1.msra.mxu0 %v3498_v14  ;;  %2595 = vmatpush3.msra.mxu1 %v3500_v15 }
 0x49b   :  { %1547 = vmatprep.subr.mxu0 %v3502_v16  ;;  %2596 = vmatprep.subr.mxu1 %v3815_v32 }
 0x49c   :  { %1548 = vmatpush1.msra.mxu0 %v3506_v17  ;;  %2597 = vmatpush3.msra.mxu1 %v3508_v18 }
 0x49d   :  { %1549 = vmatprep.subr.mxu0 %v3838_v3  ;;  %2598 = vmatprep.subr.mxu1 %v3815_v32 }
 0x49e   :  { %1550 = vmatpush1.msra.mxu0 %v3839_v19  ;;  %2599 = vmatpush3.msra.mxu1 %v3840_v20 }
 0x49f   :  { %1551 = vmatprep.subr.mxu0 %v3841_v26  ;;  %2600 = vmatprep.subr.mxu1 %v3815_v32 }
 0x4a0   :  { %1552 = vmatpush1.msra.mxu0 %v3842_v25  ;;  %1585 = vmatprep.mubr.f32.mxu0 %v3815_v32 }
 0x4a1   :  { %2601 = vmatpush3.msra.mxu1 %v3843_v29  ;;  %2602 = vmatprep.mubr.msk.f32.mxu1 %vm2871_vm0, %v3815_v32 }
 0x4a2   :  { %1750 = vmatprep.subr.mxu0 %v3844_v27  ;;  %2605 = vmatprep.subr.mxu1 %v3815_v32 }
 0x541   :  { %v1358_v28 = vpop.f32.mrf.mxu0  ;;  %v1429_v31 = vpop.f32.mrf.mxu1 }
 0x542   :  { %v1433_v37 = vadd.f32 %v1358_v28, %v3845_v34  ;;  %v1435_v28 = vadd.f32 %v1429_v31, %v3221_v59  ;;  %v3848_v31 = vld [vmem:[#allocation22_spill] sm:$0xff] }
 0x543   :  { %v1360_v22 = vpop.f32.mrf.mxu0  ;;  %v2569_v24 = vpop.f32.mrf.mxu1 }
 0x544   :  { %v1437_v23 = vrot.slane %v1433_v37, 4  ;;  %v1434_v38 = vadd.f32 %v1360_v22, %v3213_v36  ;;  %v1457_v24 = vrot.slane %v1435_v28, 4  ;;  %v3850_v28 = vld [vmem:[#allocation21_spill] sm:$0xff] }
 0x546   :  { %v1439_v39 = vadd.f32 %v1437_v23, %v3211_v8  ;;  %v1447_v29 = vrot.slane %v1434_v38, 4  ;;  %v1464_v38 = vld [vmem:[#allocation3] sm:$0x1] }
 0x548   :  { %v2199_v21 = vmul.f32 -1.442695, %v1439_v39  ;;  %v1449_v25 = vadd.f32 %v1447_v29, %v3218_v33  ;;  %v1466_v29 = vrot.slane %v1464_v38, 4  ;;  %v3853_v38 = vld [vmem:[#allocation24_spill] sm:$0xff] }
 0x54a   :  { %2726 = vpow2.f32 %v2199_v21  ;;  %v2200_v26 = vmul.f32 -1.442695, %v1449_v25 }
 0x54c   :  { %2728 = vpow2.f32 %v2200_v26 }
 0x557   :  { %v2727_v27 = vpop.eup %2726 }
 0x558   :  { %v1443_v20 = vadd.f32 1.0, %v2727_v27 }
 0x559   :  { %v2729_v19 = vpop.eup %2728 }
 0x55a   :  { %2730 = vrcp.f32 %v1443_v20  ;;  %v1453_v34 = vadd.f32 1.0, %v2729_v19  ;;  %v3847_v19 = vld [vmem:[#allocation19_spill] sm:$0xff] }
 0x55c   :  { %2732 = vrcp.f32 %v1453_v34  ;;  %v3849_v34 = vld [vmem:[#allocation20_spill] sm:$0xff] }
 0x567   :  { %v2731_v37 = vpop.eup %2730 }
 0x568   :  { %v1459_v3 = vmul.f32 %v2731_v37, %v1457_v24  ;;  %v3851_v24 = vld [vmem:[#allocation23_spill] sm:$0xff]  ;;  %v3852_v37 = vld [vmem:[#allocation17_spill] sm:$0xff] }
 0x569   :  { %v2733_v23 = vpop.eup %2732 }
 0x56a   :  { %v1460_v22 = vadd.f32 %v1459_v3, %v3224_v62  ;;  %v1462_v39 = vsub.f32 1.0, %v2733_v23  ;;  %v1468_v21 = vmul.f32 %v2733_v23, %v1466_v29  ;;  %v3846_v3 = vld [vmem:[#allocation18_spill] sm:$0xff] }
 0x56c   :  { %2734 = vtanh.f32 %v1460_v22 }
 0x579   :  { %v2735_v25 = vpop.eup %2734 }
 0x57a   :  { %v1463_v26 = vmul.f32 %v2735_v25, %v1462_v39 }
 0x57c   :  { %v1469_v27 = vadd.f32 %v1468_v21, %v1463_v26 }
 0x57e   :  { %1470 = vst [vmem:[#allocation12] sm:$0x10] %v1469_v27  ;;  %1471 = vst [vmem:[#allocation3 - $0x4] sm:$0x10] %v1469_v27 }
 0x585   :  { %v1472_v20 = vld [vmem:[#allocation3] sm:$0xff] }
 0x586   :  { %1586 = vmatmul.mubr.f32.vlgmr.msra.gmra.mxu0 %v1472_v20  ;;  %2603 = vmatmul.mubr.f32.vlgmr.msra.gmra.mxu1 %v1472_v20 }
 0x587   :  { %1751 = vmatpush1.msra.mxu0 %v3378_v40  ;;  %2606 = vmatpush3.msra.mxu1 %v3380_v41 }
 0x588   :  { %1752 = vmatprep.subr.mxu0 %v3384_v42  ;;  %2607 = vmatprep.subr.mxu1 %v3815_v32 }
 0x589   :  { %1753 = vmatpush1.msra.mxu0 %v3388_v45  ;;  %2608 = vmatpush3.msra.mxu1 %v3390_v5 }
 0x58a   :  { %1754 = vmatprep.subr.mxu0 %v3394_v44  ;;  %2609 = vmatprep.subr.mxu1 %v3815_v32 }
 0x58b   :  { %1755 = vmatpush1.msra.mxu0 %v3398_v43  ;;  %2610 = vmatpush3.msra.mxu1 %v3400_v35 }
 0x58c   :  { %1756 = vmatprep.subr.mxu0 %v3404_v30  ;;  %2611 = vmatprep.subr.mxu1 %v3815_v32 }
 0x58d   :  { %1757 = vmatpush1.msra.mxu0 %v3408_v49  ;;  %2612 = vmatpush3.msra.mxu1 %v3410_v51 }
 0x58e   :  { %1758 = vmatprep.subr.mxu0 %v3414_v48  ;;  %2613 = vmatprep.subr.mxu1 %v3815_v32 }
 0x58f   :  { %1759 = vmatpush1.msra.mxu0 %v3418_v52  ;;  %2614 = vmatpush3.msra.mxu1 %v3420_v56 }
 0x590   :  { %1760 = vmatprep.subr.mxu0 %v3424_v47  ;;  %2615 = vmatprep.subr.mxu1 %v3815_v32 }
 0x591   :  { %1761 = vmatpush1.msra.mxu0 %v3428_v53  ;;  %2616 = vmatpush3.msra.mxu1 %v3430_v46 }
 0x592   :  { %1762 = vmatprep.subr.mxu0 %v3434_v50  ;;  %2617 = vmatprep.subr.mxu1 %v3815_v32 }
 0x593   :  { %1763 = vmatpush1.msra.mxu0 %v3438_v0  ;;  %2618 = vmatpush3.msra.mxu1 %v3440_v2 }
 0x594   :  { %1764 = vmatprep.subr.mxu0 %v3444_v54  ;;  %2619 = vmatprep.subr.mxu1 %v3815_v32 }
 0x595   :  { %1765 = vmatpush1.msra.mxu0 %v3448_v55  ;;  %2620 = vmatpush3.msra.mxu1 %v3450_v57 }
 0x596   :  { %1766 = vmatprep.subr.mxu0 %v3454_v58  ;;  %2621 = vmatprep.subr.mxu1 %v3815_v32 }
 0x597   :  { %1767 = vmatpush1.msra.mxu0 %v3458_v60  ;;  %2622 = vmatpush3.msra.mxu1 %v3460_v61 }
 0x598   :  { %1768 = vmatprep.subr.mxu0 %v3464_v63  ;;  %2623 = vmatprep.subr.mxu1 %v3815_v32 }
 0x599   :  { %1769 = vmatpush1.msra.mxu0 %v3468_v1  ;;  %2624 = vmatpush3.msra.mxu1 %v3470_v4 }
 0x59a   :  { %1770 = vmatprep.subr.mxu0 %v3474_v6  ;;  %2625 = vmatprep.subr.mxu1 %v3815_v32 }
 0x59b   :  { %1771 = vmatpush1.msra.mxu0 %v3478_v7  ;;  %2626 = vmatpush3.msra.mxu1 %v3480_v9 }
 0x59c   :  { %1772 = vmatprep.subr.mxu0 %v3484_v10  ;;  %2627 = vmatprep.subr.mxu1 %v3815_v32 }
 0x59d   :  { %1773 = vmatpush1.msra.mxu0 %v3488_v11  ;;  %2628 = vmatpush3.msra.mxu1 %v3490_v12 }
 0x59e   :  { %1774 = vmatprep.subr.mxu0 %v3494_v13  ;;  %2629 = vmatprep.subr.mxu1 %v3815_v32 }
 0x59f   :  { %1775 = vmatpush1.msra.mxu0 %v3498_v14  ;;  %2630 = vmatpush3.msra.mxu1 %v3500_v15 }
 0x5a0   :  { %1776 = vmatprep.subr.mxu0 %v3502_v16  ;;  %2631 = vmatprep.subr.mxu1 %v3815_v32 }
 0x5a1   :  { %1777 = vmatpush1.msra.mxu0 %v3506_v17  ;;  %2632 = vmatpush3.msra.mxu1 %v3508_v18 }
 0x5a2   :  { %1778 = vmatprep.subr.mxu0 %v3846_v3  ;;  %2633 = vmatprep.subr.mxu1 %v3815_v32 }
 0x5a3   :  { %1779 = vmatpush1.msra.mxu0 %v3847_v19  ;;  %2634 = vmatpush3.msra.mxu1 %v3848_v31 }
 0x5a4   :  { %1780 = vmatprep.subr.mxu0 %v3849_v34  ;;  %2635 = vmatprep.subr.mxu1 %v3815_v32 }
 0x5a5   :  { %1781 = vmatpush1.msra.mxu0 %v3850_v28  ;;  %1814 = vmatprep.mubr.f32.mxu0 %v3815_v32 }
 0x5a6   :  { %2636 = vmatpush3.msra.mxu1 %v3851_v24  ;;  %2637 = vmatprep.mubr.msk.f32.mxu1 %vm2871_vm0, %v3815_v32 }
 0x5a7   :  { %1979 = vmatprep.subr.mxu0 %v3852_v37  ;;  %2640 = vmatprep.subr.mxu1 %v3815_v32 }
 0x646   :  { %v1587_v22 = vpop.f32.mrf.mxu0  ;;  %v1658_v23 = vpop.f32.mrf.mxu1 }
 0x647   :  { %v1662_v39 = vadd.f32 %v1587_v22, %v3853_v38  ;;  %v1664_v22 = vadd.f32 %v1658_v23, %v3221_v59 }
 0x648   :  { %v1589_v29 = vpop.f32.mrf.mxu0  ;;  %v2604_v25 = vpop.f32.mrf.mxu1 }
 0x649   :  { %v1666_v26 = vrot.slane %v1662_v39, 3  ;;  %v1663_v21 = vadd.f32 %v1589_v29, %v3213_v36  ;;  %v1686_v25 = vrot.slane %v1664_v22, 3 }
 0x64b   :  { %v1668_v27 = vadd.f32 %v1666_v26, %v3211_v8  ;;  %v1676_v24 = vrot.slane %v1663_v21, 3  ;;  %v1693_v21 = vld [vmem:[#allocation3] sm:$0x1] }
 0x64d   :  { %v2201_v20 = vmul.f32 -1.442695, %v1668_v27  ;;  %v1678_v28 = vadd.f32 %v1676_v24, %v3218_v33  ;;  %v1695_v24 = vrot.slane %v1693_v21, 3 }
 0x64f   :  { %2736 = vpow2.f32 %v2201_v20  ;;  %v2202_v34 = vmul.f32 -1.442695, %v1678_v28 }
 0x651   :  { %2738 = vpow2.f32 %v2202_v34 }
 0x65c   :  { %v2737_v37 = vpop.eup %2736 }
 0x65d   :  { %v1672_v31 = vadd.f32 1.0, %v2737_v37 }
 0x65e   :  { %v2739_v19 = vpop.eup %2738 }
 0x65f   :  { %2740 = vrcp.f32 %v1672_v31  ;;  %v1682_v38 = vadd.f32 1.0, %v2739_v19 }
 0x661   :  { %2742 = vrcp.f32 %v1682_v38 }
 0x66c   :  { %v2741_v39 = vpop.eup %2740 }
 0x66d   :  { %v1688_v3 = vmul.f32 %v2741_v39, %v1686_v25 }
 0x66e   :  { %v2743_v26 = vpop.eup %2742 }
 0x66f   :  { %v1689_v29 = vadd.f32 %v1688_v3, %v3224_v62  ;;  %v1691_v27 = vsub.f32 1.0, %v2743_v26  ;;  %v1697_v20 = vmul.f32 %v2743_v26, %v1695_v24 }
 0x671   :  { %2744 = vtanh.f32 %v1689_v29 }
 0x67e   :  { %v2745_v28 = vpop.eup %2744 }
 0x67f   :  { %v1692_v34 = vmul.f32 %v2745_v28, %v1691_v27 }
 0x681   :  { %v1698_v37 = vadd.f32 %v1697_v20, %v1692_v34 }
 0x683   :  { %1699 = vst [vmem:[#allocation12] sm:$0x20] %v1698_v37  ;;  %1700 = vst [vmem:[#allocation3 - $0x5] sm:$0x20] %v1698_v37 }
 0x68a   :  { %v1701_v31 = vld [vmem:[#allocation3] sm:$0xff] }
 0x68b   :  { %1815 = vmatmul.mubr.f32.vlgmr.msra.gmra.mxu0 %v1701_v31  ;;  %2638 = vmatmul.mubr.f32.vlgmr.msra.gmra.mxu1 %v1701_v31 }
 0x68c   :  { %1980 = vmatpush1.msra.mxu0 %v3378_v40  ;;  %2641 = vmatpush3.msra.mxu1 %v3380_v41  ;;  %v3854_v40 = vld [vmem:[#allocation18_spill] sm:$0xff]  ;;  %v3855_v41 = vld [vmem:[#allocation19_spill] sm:$0xff] }
 0x68d   :  { %1981 = vmatprep.subr.mxu0 %v3384_v42  ;;  %2642 = vmatprep.subr.mxu1 %v3815_v32  ;;  %v3856_v42 = vld [vmem:[#allocation22_spill] sm:$0xff] }
 0x68e   :  { %1982 = vmatpush1.msra.mxu0 %v3388_v45  ;;  %2643 = vmatpush3.msra.mxu1 %v3390_v5  ;;  %v3857_v45 = vld [vmem:[#allocation20_spill] sm:$0xff]  ;;  %v3858_v5 = vld [vmem:[#allocation21_spill] sm:$0xff] }
 0x68f   :  { %1983 = vmatprep.subr.mxu0 %v3394_v44  ;;  %2644 = vmatprep.subr.mxu1 %v3815_v32  ;;  %v3859_v44 = vld [vmem:[#allocation23_spill] sm:$0xff] }
 0x690   :  { %1984 = vmatpush1.msra.mxu0 %v3398_v43  ;;  %2645 = vmatpush3.msra.mxu1 %v3400_v35 }
 0x691   :  { %1985 = vmatprep.subr.mxu0 %v3404_v30  ;;  %2646 = vmatprep.subr.mxu1 %v3815_v32  ;;  %v3860_v30 = vld [vmem:[#allocation24_spill] sm:$0xff] }
 0x692   :  { %1986 = vmatpush1.msra.mxu0 %v3408_v49  ;;  %2647 = vmatpush3.msra.mxu1 %v3410_v51 }
 0x693   :  { %1987 = vmatprep.subr.mxu0 %v3414_v48  ;;  %2648 = vmatprep.subr.mxu1 %v3815_v32 }
 0x694   :  { %1988 = vmatpush1.msra.mxu0 %v3418_v52  ;;  %2649 = vmatpush3.msra.mxu1 %v3420_v56 }
 0x695   :  { %1989 = vmatprep.subr.mxu0 %v3424_v47  ;;  %2650 = vmatprep.subr.mxu1 %v3815_v32 }
 0x696   :  { %1990 = vmatpush1.msra.mxu0 %v3428_v53  ;;  %2651 = vmatpush3.msra.mxu1 %v3430_v46 }
 0x697   :  { %1991 = vmatprep.subr.mxu0 %v3434_v50  ;;  %2652 = vmatprep.subr.mxu1 %v3815_v32 }
 0x698   :  { %1992 = vmatpush1.msra.mxu0 %v3438_v0  ;;  %2653 = vmatpush3.msra.mxu1 %v3440_v2 }
 0x699   :  { %1993 = vmatprep.subr.mxu0 %v3444_v54  ;;  %2654 = vmatprep.subr.mxu1 %v3815_v32 }
 0x69a   :  { %1994 = vmatpush1.msra.mxu0 %v3448_v55  ;;  %2655 = vmatpush3.msra.mxu1 %v3450_v57 }
 0x69b   :  { %1995 = vmatprep.subr.mxu0 %v3454_v58  ;;  %2656 = vmatprep.subr.mxu1 %v3815_v32 }
 0x69c   :  { %1996 = vmatpush1.msra.mxu0 %v3458_v60  ;;  %2657 = vmatpush3.msra.mxu1 %v3460_v61 }
 0x69d   :  { %1997 = vmatprep.subr.mxu0 %v3464_v63  ;;  %2658 = vmatprep.subr.mxu1 %v3815_v32 }
 0x69e   :  { %1998 = vmatpush1.msra.mxu0 %v3468_v1  ;;  %2659 = vmatpush3.msra.mxu1 %v3470_v4  ;;  %v1922_v4 = vld [vmem:[#allocation3] sm:$0x1] }
 0x69f   :  { %1999 = vmatprep.subr.mxu0 %v3474_v6  ;;  %2660 = vmatprep.subr.mxu1 %v3815_v32 }
 0x6a0   :  { %2000 = vmatpush1.msra.mxu0 %v3478_v7  ;;  %2661 = vmatpush3.msra.mxu1 %v3480_v9  ;;  %v1924_v7 = vrot.slane %v1922_v4, 2 }
 0x6a1   :  { %2001 = vmatprep.subr.mxu0 %v3484_v10  ;;  %2662 = vmatprep.subr.mxu1 %v3815_v32 }
 0x6a2   :  { %2002 = vmatpush1.msra.mxu0 %v3488_v11  ;;  %2663 = vmatpush3.msra.mxu1 %v3490_v12 }
 0x6a3   :  { %2003 = vmatprep.subr.mxu0 %v3494_v13  ;;  %2664 = vmatprep.subr.mxu1 %v3815_v32 }
 0x6a4   :  { %2004 = vmatpush1.msra.mxu0 %v3498_v14  ;;  %2665 = vmatpush3.msra.mxu1 %v3500_v15 }
 0x6a5   :  { %2005 = vmatprep.subr.mxu0 %v3502_v16  ;;  %2666 = vmatprep.subr.mxu1 %v3815_v32 }
 0x6a6   :  { %2006 = vmatpush1.msra.mxu0 %v3506_v17  ;;  %2667 = vmatpush3.msra.mxu1 %v3508_v18 }
 0x6a7   :  { %2007 = vmatprep.subr.mxu0 %v3854_v40  ;;  %2668 = vmatprep.subr.mxu1 %v3815_v32 }
 0x6a8   :  { %2008 = vmatpush1.msra.mxu0 %v3855_v41  ;;  %2669 = vmatpush3.msra.mxu1 %v3856_v42 }
 0x6a9   :  { %2009 = vmatprep.subr.mxu0 %v3857_v45  ;;  %2670 = vmatprep.subr.mxu1 %v3815_v32 }
 0x6aa   :  { %2010 = vmatpush1.msra.mxu0 %v3858_v5  ;;  %2043 = vmatprep.mubr.f32.mxu0 %v3815_v32 }
 0x6ab   :  { %2671 = vmatpush3.msra.mxu1 %v3859_v44  ;;  %2672 = vmatprep.mubr.msk.f32.mxu1 %vm2871_vm0, %v3815_v32 }
 0x74b   :  { %v1816_v43 = vpop.f32.mrf.mxu0  ;;  %v1887_v35 = vpop.f32.mrf.mxu1 }
 0x74c   :  { %v1891_v49 = vadd.f32 %v1816_v43, %v3860_v30  ;;  %v1893_v55 = vadd.f32 %v1887_v35, %v3221_v59 }
 0x74d   :  { %v1818_v51 = vpop.f32.mrf.mxu0  ;;  %v2639_v48 = vpop.f32.mrf.mxu1 }
 0x74e   :  { %v1895_v52 = vrot.slane %v1891_v49, 2  ;;  %v1892_v56 = vadd.f32 %v1818_v51, %v3213_v36  ;;  %v1915_v58 = vrot.slane %v1893_v55, 2 }
 0x750   :  { %v1897_v47 = vadd.f32 %v1895_v52, %v3211_v8  ;;  %v1905_v46 = vrot.slane %v1892_v56, 2 }
 0x752   :  { %v2203_v53 = vmul.f32 -1.442695, %v1897_v47  ;;  %v1907_v50 = vadd.f32 %v1905_v46, %v3218_v33 }
 0x754   :  { %2746 = vpow2.f32 %v2203_v53  ;;  %v2204_v0 = vmul.f32 -1.442695, %v1907_v50 }
 0x756   :  { %2748 = vpow2.f32 %v2204_v0 }
 0x761   :  { %v2747_v2 = vpop.eup %2746 }
 0x762   :  { %v1901_v32 = vadd.f32 1.0, %v2747_v2 }
 0x763   :  { %v2749_v54 = vpop.eup %2748 }
 0x764   :  { %2750 = vrcp.f32 %v1901_v32  ;;  %v1911_v57 = vadd.f32 1.0, %v2749_v54 }
 0x766   :  { %2752 = vrcp.f32 %v1911_v57 }
 0x771   :  { %v2751_v60 = vpop.eup %2750 }
 0x772   :  { %v1917_v61 = vmul.f32 %v2751_v60, %v1915_v58 }
 0x773   :  { %v2753_v1 = vpop.eup %2752 }
 0x774   :  { %v1918_v63 = vadd.f32 %v1917_v61, %v3224_v62  ;;  %v1920_v6 = vsub.f32 1.0, %v2753_v1  ;;  %v1926_v11 = vmul.f32 %v2753_v1, %v1924_v7 }
 0x776   :  { %2754 = vtanh.f32 %v1918_v63 }
 0x783   :  { %v2755_v9 = vpop.eup %2754 }
 0x784   :  { %v1921_v10 = vmul.f32 %v2755_v9, %v1920_v6 }
 0x786   :  { %v1927_v12 = vadd.f32 %v1926_v11, %v1921_v10 }
 0x788   :  { %1928 = vst [vmem:[#allocation12] sm:$0x40] %v1927_v12  ;;  %1929 = vst [vmem:[#allocation3 - $0x6] sm:$0x40] %v1927_v12 }
 0x78f   :  { %v1930_v13 = vld [vmem:[#allocation3] sm:$0xff] }
 0x790   :  { %2044 = vmatmul.mubr.f32.vlgmr.msra.gmra.mxu0 %v1930_v13  ;;  %2673 = vmatmul.mubr.f32.vlgmr.msra.gmra.mxu1 %v1930_v13  ;;  %v2151_v37 = vld [vmem:[#allocation3] sm:$0x1] }
 0x850   :  { %v2045_v14 = vpop.f32.mrf.mxu0  ;;  %v2116_v15 = vpop.f32.mrf.mxu1 }
 0x851   :  { %v2120_v16 = vadd.f32 %v2045_v14, %v3860_v30  ;;  %v2122_v27 = vadd.f32 %v2116_v15, %v3221_v59 }
 0x852   :  { %v2047_v17 = vpop.f32.mrf.mxu0  ;;  %v2674_v18 = vpop.f32.mrf.mxu1 }
 0x853   :  { %v2124_v3 = vrot.slane %v2120_v16, 1  ;;  %v2121_v19 = vadd.f32 %v2047_v17, %v3213_v36  ;;  %v2144_v28 = vrot.slane %v2122_v27, 1 }
 0x855   :  { %v2126_v23 = vadd.f32 %v2124_v3, %v3211_v8  ;;  %v2134_v22 = vrot.slane %v2121_v19, 1 }
 0x857   :  { %v2205_v38 = vmul.f32 -1.442695, %v2126_v23  ;;  %v2136_v25 = vadd.f32 %v2134_v22, %v3218_v33  ;;  %v2153_v33 = vrot.slane %v2151_v37, 1 }
 0x859   :  { %2756 = vpow2.f32 %v2205_v38  ;;  %v2206_v39 = vmul.f32 -1.442695, %v2136_v25 }
 0x85b   :  { %2758 = vpow2.f32 %v2206_v39 }
 0x866   :  { %v2757_v29 = vpop.eup %2756 }
 0x867   :  { %v2130_v26 = vadd.f32 1.0, %v2757_v29 }
 0x868   :  { %v2759_v21 = vpop.eup %2758 }
 0x869   :  { %2760 = vrcp.f32 %v2130_v26  ;;  %v2140_v24 = vadd.f32 1.0, %v2759_v21 }
 0x86b   :  { %2762 = vrcp.f32 %v2140_v24 }
 0x876   :  { %v2761_v34 = vpop.eup %2760 }
 0x877   :  { %v2146_v20 = vmul.f32 %v2761_v34, %v2144_v28 }
 0x878   :  { %v2763_v36 = vpop.eup %2762 }
 0x879   :  { %v2147_v8 = vadd.f32 %v2146_v20, %v3224_v62  ;;  %v2149_v31 = vsub.f32 1.0, %v2763_v36  ;;  %v2155_v42 = vmul.f32 %v2763_v36, %v2153_v33 }
 0x87b   :  { %2764 = vtanh.f32 %v2147_v8 }
 0x888   :  { %v2765_v40 = vpop.eup %2764 }
 0x889   :  { %v2150_v41 = vmul.f32 %v2765_v40, %v2149_v31 }
 0x88b   :  { %v2156_v45 = vadd.f32 %v2155_v42, %v2150_v41 }
 0x88d   :  { %2158 = vst [vmem:[#allocation3 - $0x7] sm:$0x80] %v2156_v45  ;;  %2157 = vst [vmem:[#allocation12] sm:$0x80] %v2156_v45 }
 0x88e   :  { %2845 = shalt.err (!%p2842_p5)
}
 0x88f   :  { %2168 = dma.vmem_to_hbm [thread:$0]  %s2166_s11, 128, %s3774_s6, [#allocation8]  }
 0x890   :  { %2860 = dma.done.wait [#allocation8], 128  }
 0x891   :  { %2861 = vsyncadd [#allocation8], 4294967168 }
 0x892   :  { %2172 = vsyncpa [#allocation7], 1 }
 0x893   :  { %2173 = vsyncpa [#allocation10], 1 }
 0x894   :  { %2174 = vsyncpa [#allocation8], 1 }

</bundles_post_ra>
